<compile_context>
chip_gen: v7x
topology: tpu7x:2x2x1
jax: 0.10.0
libtpu: 0.0.40
codegen_flags: <defaults>
</compile_context>

<pallas_src>
import functools

import jax
import jax.numpy as jnp
import numpy as np
from jax import lax
from jax.experimental import pallas as pl
from jax.experimental.pallas import tpu as pltpu

K_CONV = 7
PAD_CONV = 2


# ----------------------------------------------------------------------------
# Fused kernel.
#   xe_ref / xo_ref : ((L+3)*Bp, E) bf16  even / odd input times, row = t*Bp+b
#   wconv_ref       : (7*E, E)      bf16  tap k occupies rows [k*E, (k+1)*E)
#   bconv_ref       : (1, E)        f32
#   wih_ref         : (E, 4H)       bf16  gate order i,f,g,o (PyTorch W_ih.T)
#   whh_ref         : (H, 4H)       f32
#   bgate_ref       : (1, 4H)       f32   b_ih + b_hh
#   wlin_ref        : (H, 2), blin_ref : (1, 2)   f32
#   h0/c0           : (Bp, H)       f32
# Outputs: pred (Bp,2) log-probs, hn (Bp,H), cn (Bp,H)
# Scratch: xproj_ref (L*Bp, 4H) f32
# ----------------------------------------------------------------------------
def fused_lstm_imdb_kernel(xe_ref, xo_ref, wconv_ref, bconv_ref,
                           wih_ref, whh_ref, bgate_ref,
                           wlin_ref, blin_ref, h0_ref, c0_ref,
                           pred_ref, hn_ref, cn_ref,
                           xproj_ref,
                           *, Bp, E, H, L):
    f32 = jnp.float32
    M = L * Bp

    xe = xe_ref[...]                      # ((L+3)*Bp, E) bf16
    xo = xo_ref[...]
    wc = wconv_ref[...]                   # (7E, E) bf16

    def tap(k):                           # (E, E) weight for conv tap k
        return wc[k * E:(k + 1) * E, :]

    # ---- Conv1d(E->E, k=7, pad=2): 7 shifted bf16 matmuls, f32 accumulation.
    # y_e rows = conv output at even times (time-major, batch minor),
    # y_o rows = conv output at odd times.
    y_e = jnp.dot(xe[0:M, :], tap(0), preferred_element_type=f32)
    y_o = jnp.dot(xo[0:M, :], tap(0), preferred_element_type=f32)
    for m in range(1, 4):                                  # even taps 2,4,6
        y_e = y_e + jnp.dot(xe[m * Bp:m * Bp + M, :], tap(2 * m),
                            preferred_element_type=f32)
        y_o = y_o + jnp.dot(xo[m * Bp:m * Bp + M, :], tap(2 * m),
                            preferred_element_type=f32)
    for m in range(3):                                     # odd taps 1,3,5
        y_e = y_e + jnp.dot(xo[m * Bp:m * Bp + M, :], tap(2 * m + 1),
                            preferred_element_type=f32)
        y_o = y_o + jnp.dot(xe[(m + 1) * Bp:(m + 1) * Bp + M, :], tap(2 * m + 1),
                            preferred_element_type=f32)

    # ---- MaxPool1d(2) + ReLU: contiguous halves -> pure VPU, no shuffles.
    z = jnp.maximum(jnp.maximum(y_e, y_o) + bconv_ref[...], 0.0)   # (L*Bp, E)

    # ---- LSTM input projection for all timesteps in one bf16 MXU matmul.
    xproj_ref[...] = (jnp.dot(z.astype(jnp.bfloat16), wih_ref[...],
                              preferred_element_type=f32)
                      + bgate_ref[...])                            # (L*Bp, 4H)

    whh = whh_ref[...]                                             # (H, 4H)

    def step(t, carry):
        h, c = carry
        row = pl.multiple_of(t * Bp, Bp)
        gates = (xproj_ref[pl.ds(row, Bp), :]
                 + jnp.dot(h, whh, preferred_element_type=f32))    # (Bp, 4H)
        # Whole-tile activations (2 EUP passes), then lane slices i,f,g,o.
        sig = jax.nn.sigmoid(gates)
        th = jnp.tanh(gates)
        c_new = sig[:, H:2 * H] * c + sig[:, 0:H] * th[:, 2 * H:3 * H]
        h_new = sig[:, 3 * H:4 * H] * jnp.tanh(c_new)
        return h_new, c_new

    h, c = lax.fori_loop(0, L, step, (h0_ref[...], c0_ref[...]))

    hn_ref[...] = h
    cn_ref[...] = c

    # ---- Linear(H->2) + log_softmax epilogue (runs once).
    logits = (jnp.dot(h, wlin_ref[...], preferred_element_type=f32)
              + blin_ref[...])                                     # (Bp, 2)
    mx = jnp.max(logits, axis=-1, keepdims=True)
    lse = mx + jnp.log(jnp.sum(jnp.exp(logits - mx), axis=-1, keepdims=True))
    pred_ref[...] = logits - lse


def fused_lstm_imdb(xe, xo, w_conv, b_conv, wih, whh, b_gate, wlin, blin,
                    h0, c0, *, Bp, E, H, L):
    kernel = functools.partial(fused_lstm_imdb_kernel, Bp=Bp, E=E, H=H, L=L)
    Mx = (L + 3) * Bp

    def full(shape):
        return pl.BlockSpec(shape, lambda i, _s=shape: (0,) * len(_s))

    return pl.pallas_call(
        kernel,
        grid=(1,),
        in_specs=[
            full((Mx, E)),            # xe (bf16)
            full((Mx, E)),            # xo (bf16)
            full((K_CONV * E, E)),    # conv weight (bf16)
            full((1, E)),             # conv bias
            full((E, 4 * H)),         # W_ih.T (bf16)
            full((H, 4 * H)),         # W_hh.T
            full((1, 4 * H)),         # b_ih + b_hh
            full((H, 2)),             # W_lin.T
            full((1, 2)),             # b_lin
            full((Bp, H)),            # h0
            full((Bp, H)),            # c0
        ],
        out_specs=(full((Bp, 2)), full((Bp, H)), full((Bp, H))),
        out_shape=(
            jax.ShapeDtypeStruct((Bp, 2), jnp.float32),
            jax.ShapeDtypeStruct((Bp, H), jnp.float32),
            jax.ShapeDtypeStruct((Bp, H), jnp.float32),
        ),
        scratch_shapes=[pltpu.VMEM((L * Bp, 4 * H), jnp.float32)],
        compiler_params=pltpu.CompilerParams(
            dimension_semantics=("arbitrary",),
            vmem_limit_bytes=64 * 1024 * 1024),
    )(xe, xo, w_conv, b_conv, wih, whh, b_gate, wlin, blin, h0, c0)


# ----------------------------------------------------------------------------
# Full forward. Wrapper only does glue: embedding gather, batch/time padding,
# parity de-interleave and (time, batch)-major layout.
# ----------------------------------------------------------------------------
def lstm_imdb_forward(inputs, hidden, prm):
    h0, c0 = hidden                                    # each (1, B, H)
    B, T = inputs.shape
    H = h0.shape[-1]
    E = prm["emb"].shape[-1]

    # Embedding lookup (data-dependent HBM gather) kept in plain JAX.
    x = jnp.take(prm["emb"], inputs, axis=0)           # (B, T, E) f32

    # Pad batch to a multiple of 8 (f32 sublane count).
    Bp = max(8, -(-B // 8) * 8)
    if Bp != B:
        x = jnp.pad(x, ((0, Bp - B), (0, 0), (0, 0)))
        h0b = jnp.pad(h0[0], ((0, Bp - B), (0, 0)))
        c0b = jnp.pad(c0[0], ((0, Bp - B), (0, 0)))
    else:
        h0b, c0b = h0[0], c0[0]

    # Conv zero-padding along time; parity de-interleave (even/odd times).
    x_pad = jnp.pad(x, ((0, 0), (PAD_CONV, PAD_CONV), (0, 0)))   # (Bp, Tpad, E)
    Tpad = T + 2 * PAD_CONV
    Tout = Tpad - K_CONV + 1
    L = Tout // 2
    n_half = L + 3                       # taps needed per parity slab
    x_e = x_pad[:, 0::2, :]
    x_o = x_pad[:, 1::2, :]
    assert x_e.shape[1] >= n_half and x_o.shape[1] >= n_half
    x_e = x_e[:, :n_half, :]
    x_o = x_o[:, :n_half, :]
    # (time, batch)-major, bf16 MXU operands.
    xe_tm = jnp.transpose(x_e, (1, 0, 2)).reshape(n_half * Bp, E).astype(jnp.bfloat16)
    xo_tm = jnp.transpose(x_o, (1, 0, 2)).reshape(n_half * Bp, E).astype(jnp.bfloat16)

    pred, hn, cn = fused_lstm_imdb(
        xe_tm, xo_tm, prm["conv_w_col"], prm["conv_b_2d"],
        prm["wih_T"], prm["whh_T"], prm["b_gate"],
        prm["wlin_T"], prm["blin_2d"], h0b, c0b,
        Bp=Bp, E=E, H=H, L=L)

    # dropout1 / dropout2: eval-mode identities.
    return pred[:B], (hn[:B][None], cn[:B][None])


# ----------------------------------------------------------------------------
# Pure-JAX f32 reference (no Pallas) for verification.
# ----------------------------------------------------------------------------
def reference_forward(inputs, hidden, prm_pt):
    h0, c0 = hidden
    B = inputs.shape[0]
    x = prm_pt["emb"][inputs]                                    # (B,T,E)
    E = x.shape[-1]
    x_pad = jnp.pad(x, ((0, 0), (2, 2), (0, 0)))
    K = 7
    Tout = x_pad.shape[1] - K + 1
    y = jnp.zeros((B, Tout, E), jnp.float32)
    for k in range(K):
        y = y + x_pad[:, k:k + Tout, :] @ prm_pt["conv_w"][:, :, k].T
    y = y + prm_pt["conv_b"]
    L = Tout // 2
    z = jnp.maximum(y[:, :2 * L, :].reshape(B, L, 2, E).max(axis=2), 0.0)
    h, c = h0[0], c0[0]
    H = h.shape[-1]
    bb = prm_pt["b_ih"] + prm_pt["b_hh"]
    for t in range(L):
        g = z[:, t, :] @ prm_pt["W_ih"].T + h @ prm_pt["W_hh"].T + bb
        i = jax.nn.sigmoid(g[:, :H])
        f = jax.nn.sigmoid(g[:, H:2 * H])
        gg = jnp.tanh(g[:, 2 * H:3 * H])
        o = jax.nn.sigmoid(g[:, 3 * H:4 * H])
        c = f * c + i * gg
        h = o * jnp.tanh(c)
    logits = h @ prm_pt["W_lin"].T + prm_pt["b_lin"]
    return jax.nn.log_softmax(logits, axis=-1), h, c


if __name__ == "__main__":
    # Small config: vocab=50, embed_dim=32, hidden_dim=32, batch=2, seq=18.
    V, E, H, B, T = 50, 32, 32, 2, 18
    key = jax.random.PRNGKey(0)
    ks = jax.random.split(key, 8)

    # Deterministic "PyTorch-shaped" parameters.
    prm_pt = {
        "emb": jax.random.normal(ks[0], (V, E), jnp.float32) * 0.1,
        "conv_w": jax.random.normal(ks[1], (E, E, 7), jnp.float32) * 0.05,  # (out,in,K)
        "conv_b": jax.random.normal(ks[2], (E,), jnp.float32) * 0.05,
        "W_ih": jax.random.normal(ks[3], (4 * H, E), jnp.float32) * 0.1,    # i,f,g,o
        "W_hh": jax.random.normal(ks[4], (4 * H, H), jnp.float32) * 0.1,
        "b_ih": jax.random.normal(ks[5], (4 * H,), jnp.float32) * 0.1,
        "b_hh": jnp.zeros((4 * H,), jnp.float32),
        "W_lin": jax.random.normal(ks[6], (2, H), jnp.float32) * 0.1,
        "b_lin": jnp.zeros((2,), jnp.float32),
    }

    # Kernel-layout parameters (pre-transposed / fused gates / per-tap weights).
    prm = {
        "emb": prm_pt["emb"],
        # (out,in,K) -> (K,in,out) -> (K*in, out); tap k = rows [k*E,(k+1)*E).
        "conv_w_col": jnp.transpose(prm_pt["conv_w"], (2, 1, 0))
                         .reshape(7 * E, E).astype(jnp.bfloat16),
        "conv_b_2d": prm_pt["conv_b"].reshape(1, E),
        "wih_T": prm_pt["W_ih"].T.astype(jnp.bfloat16),                     # (E, 4H)
        "whh_T": prm_pt["W_hh"].T,                                          # (H, 4H)
        "b_gate": (prm_pt["b_ih"] + prm_pt["b_hh"]).reshape(1, 4 * H),
        "wlin_T": prm_pt["W_lin"].T,                                        # (H, 2)
        "blin_2d": prm_pt["b_lin"].reshape(1, 2),
    }

    inputs = jax.random.randint(ks[7], (B, T), 0, V, dtype=jnp.int32)
    hidden = (jnp.zeros((1, B, H), jnp.float32),
              jnp.zeros((1, B, H), jnp.float32))      # init_hidden(batch_size)

    fwd = jax.jit(lstm_imdb_forward)
    pred, (hn, cn) = fwd(inputs, hidden, prm)
    jax.block_until_ready((pred, hn, cn))

    ref_pred, ref_h, ref_c = reference_forward(inputs, hidden, prm_pt)
    np.testing.assert_allclose(np.asarray(pred), np.asarray(ref_pred),
                               rtol=1e-2, atol=5e-3)
    np.testing.assert_allclose(np.asarray(hn[0]), np.asarray(ref_h),
                               rtol=1e-2, atol=5e-3)
    np.testing.assert_allclose(np.asarray(cn[0]), np.asarray(ref_c),
                               rtol=1e-2, atol=5e-3)

    print("KERNEL_OK")
</pallas_src>

<mosaic_0001>
module attributes {stable_mosaic.version = 11 : i64} {
  func.func @fused_lstm_imdb_kernel(%arg0: i32, %arg1: memref<88x32xbf16, #tpu.memory_space<vmem>>, %arg2: memref<88x32xbf16, #tpu.memory_space<vmem>>, %arg3: memref<224x32xbf16, #tpu.memory_space<vmem>>, %arg4: memref<1x32xf32, #tpu.memory_space<vmem>>, %arg5: memref<32x128xbf16, #tpu.memory_space<vmem>>, %arg6: memref<32x128xf32, #tpu.memory_space<vmem>>, %arg7: memref<1x128xf32, #tpu.memory_space<vmem>>, %arg8: memref<32x2xf32, #tpu.memory_space<vmem>>, %arg9: memref<1x2xf32, #tpu.memory_space<vmem>>, %arg10: memref<8x32xf32, #tpu.memory_space<vmem>>, %arg11: memref<8x32xf32, #tpu.memory_space<vmem>>, %arg12: memref<8x2xf32, #tpu.memory_space<vmem>>, %arg13: memref<8x32xf32, #tpu.memory_space<vmem>>, %arg14: memref<8x32xf32, #tpu.memory_space<vmem>>, %arg15: memref<64x128xf32, #tpu.memory_space<vmem>>) attributes {dimension_semantics = [#tpu.dimension_semantics<arbitrary>], iteration_bounds = array<i64: 1>, scalar_prefetch = 0 : i64, scratch_operands = 1 : i64, tpu.core_type = #tpu.core_type<tc>, window_params = [{pipeline_mode = #tpu.pipeline_mode<synchronous>, transform_indices = @transform_0, window_bounds = array<i64: 88, 32>}, {pipeline_mode = #tpu.pipeline_mode<synchronous>, transform_indices = @transform_1, window_bounds = array<i64: 88, 32>}, {pipeline_mode = #tpu.pipeline_mode<synchronous>, transform_indices = @transform_2, window_bounds = array<i64: 224, 32>}, {pipeline_mode = #tpu.pipeline_mode<synchronous>, transform_indices = @transform_3, window_bounds = array<i64: 1, 32>}, {pipeline_mode = #tpu.pipeline_mode<synchronous>, transform_indices = @transform_4, window_bounds = array<i64: 32, 128>}, {pipeline_mode = #tpu.pipeline_mode<synchronous>, transform_indices = @transform_5, window_bounds = array<i64: 32, 128>}, {pipeline_mode = #tpu.pipeline_mode<synchronous>, transform_indices = @transform_6, window_bounds = array<i64: 1, 128>}, {pipeline_mode = #tpu.pipeline_mode<synchronous>, transform_indices = @transform_7, window_bounds = array<i64: 32, 2>}, {pipeline_mode = #tpu.pipeline_mode<synchronous>, transform_indices = @transform_8, window_bounds = array<i64: 1, 2>}, {pipeline_mode = #tpu.pipeline_mode<synchronous>, transform_indices = @transform_9, window_bounds = array<i64: 8, 32>}, {pipeline_mode = #tpu.pipeline_mode<synchronous>, transform_indices = @transform_10, window_bounds = array<i64: 8, 32>}, {pipeline_mode = #tpu.pipeline_mode<synchronous>, transform_indices = @transform_11, window_bounds = array<i64: 8, 2>}, {pipeline_mode = #tpu.pipeline_mode<synchronous>, transform_indices = @transform_12, window_bounds = array<i64: 8, 32>}, {pipeline_mode = #tpu.pipeline_mode<synchronous>, transform_indices = @transform_13, window_bounds = array<i64: 8, 32>}]} {
    %c0 = arith.constant 0 : index
    %c0_0 = arith.constant 0 : index
    %0 = vector.load %arg1[%c0, %c0_0] : memref<88x32xbf16, #tpu.memory_space<vmem>>, vector<88x32xbf16>
    %c0_1 = arith.constant 0 : index
    %c0_2 = arith.constant 0 : index
    %1 = vector.load %arg2[%c0_1, %c0_2] : memref<88x32xbf16, #tpu.memory_space<vmem>>, vector<88x32xbf16>
    %c0_3 = arith.constant 0 : index
    %c0_4 = arith.constant 0 : index
    %2 = vector.load %arg3[%c0_3, %c0_4] : memref<224x32xbf16, #tpu.memory_space<vmem>>, vector<224x32xbf16>
    %3 = vector.extract_strided_slice %0 {offsets = [0, 0], sizes = [64, 32], strides = [1, 1]} : vector<88x32xbf16> to vector<64x32xbf16>
    %4 = vector.extract_strided_slice %2 {offsets = [0, 0], sizes = [32, 32], strides = [1, 1]} : vector<224x32xbf16> to vector<32x32xbf16>
    %cst = arith.constant dense<0.000000e+00> : vector<64x32xf32>
    %5 = tpu.matmul %3, %4, %cst {dimension_numbers = #tpu.dot_dimension_numbers<[1], [0], [0], [1], [0, 0, 1, 1], [], []>} : vector<64x32xbf16>, vector<32x32xbf16>, vector<64x32xf32> -> vector<64x32xf32>
    %6 = vector.extract_strided_slice %1 {offsets = [0, 0], sizes = [64, 32], strides = [1, 1]} : vector<88x32xbf16> to vector<64x32xbf16>
    %7 = vector.extract_strided_slice %2 {offsets = [0, 0], sizes = [32, 32], strides = [1, 1]} : vector<224x32xbf16> to vector<32x32xbf16>
    %cst_5 = arith.constant dense<0.000000e+00> : vector<64x32xf32>
    %8 = tpu.matmul %6, %7, %cst_5 {dimension_numbers = #tpu.dot_dimension_numbers<[1], [0], [0], [1], [0, 0, 1, 1], [], []>} : vector<64x32xbf16>, vector<32x32xbf16>, vector<64x32xf32> -> vector<64x32xf32>
    %9 = vector.extract_strided_slice %0 {offsets = [8, 0], sizes = [64, 32], strides = [1, 1]} : vector<88x32xbf16> to vector<64x32xbf16>
    %10 = vector.extract_strided_slice %2 {offsets = [64, 0], sizes = [32, 32], strides = [1, 1]} : vector<224x32xbf16> to vector<32x32xbf16>
    %cst_6 = arith.constant dense<0.000000e+00> : vector<64x32xf32>
    %11 = tpu.matmul %9, %10, %cst_6 {dimension_numbers = #tpu.dot_dimension_numbers<[1], [0], [0], [1], [0, 0, 1, 1], [], []>} : vector<64x32xbf16>, vector<32x32xbf16>, vector<64x32xf32> -> vector<64x32xf32>
    %12 = arith.addf %5, %11 : vector<64x32xf32>
    %13 = vector.extract_strided_slice %1 {offsets = [8, 0], sizes = [64, 32], strides = [1, 1]} : vector<88x32xbf16> to vector<64x32xbf16>
    %14 = vector.extract_strided_slice %2 {offsets = [64, 0], sizes = [32, 32], strides = [1, 1]} : vector<224x32xbf16> to vector<32x32xbf16>
    %cst_7 = arith.constant dense<0.000000e+00> : vector<64x32xf32>
    %15 = tpu.matmul %13, %14, %cst_7 {dimension_numbers = #tpu.dot_dimension_numbers<[1], [0], [0], [1], [0, 0, 1, 1], [], []>} : vector<64x32xbf16>, vector<32x32xbf16>, vector<64x32xf32> -> vector<64x32xf32>
    %16 = arith.addf %8, %15 : vector<64x32xf32>
    %17 = vector.extract_strided_slice %0 {offsets = [16, 0], sizes = [64, 32], strides = [1, 1]} : vector<88x32xbf16> to vector<64x32xbf16>
    %18 = vector.extract_strided_slice %2 {offsets = [128, 0], sizes = [32, 32], strides = [1, 1]} : vector<224x32xbf16> to vector<32x32xbf16>
    %cst_8 = arith.constant dense<0.000000e+00> : vector<64x32xf32>
    %19 = tpu.matmul %17, %18, %cst_8 {dimension_numbers = #tpu.dot_dimension_numbers<[1], [0], [0], [1], [0, 0, 1, 1], [], []>} : vector<64x32xbf16>, vector<32x32xbf16>, vector<64x32xf32> -> vector<64x32xf32>
    %20 = arith.addf %12, %19 : vector<64x32xf32>
    %21 = vector.extract_strided_slice %1 {offsets = [16, 0], sizes = [64, 32], strides = [1, 1]} : vector<88x32xbf16> to vector<64x32xbf16>
    %22 = vector.extract_strided_slice %2 {offsets = [128, 0], sizes = [32, 32], strides = [1, 1]} : vector<224x32xbf16> to vector<32x32xbf16>
    %cst_9 = arith.constant dense<0.000000e+00> : vector<64x32xf32>
    %23 = tpu.matmul %21, %22, %cst_9 {dimension_numbers = #tpu.dot_dimension_numbers<[1], [0], [0], [1], [0, 0, 1, 1], [], []>} : vector<64x32xbf16>, vector<32x32xbf16>, vector<64x32xf32> -> vector<64x32xf32>
    %24 = arith.addf %16, %23 : vector<64x32xf32>
    %25 = vector.extract_strided_slice %0 {offsets = [24, 0], sizes = [64, 32], strides = [1, 1]} : vector<88x32xbf16> to vector<64x32xbf16>
    %26 = vector.extract_strided_slice %2 {offsets = [192, 0], sizes = [32, 32], strides = [1, 1]} : vector<224x32xbf16> to vector<32x32xbf16>
    %cst_10 = arith.constant dense<0.000000e+00> : vector<64x32xf32>
    %27 = tpu.matmul %25, %26, %cst_10 {dimension_numbers = #tpu.dot_dimension_numbers<[1], [0], [0], [1], [0, 0, 1, 1], [], []>} : vector<64x32xbf16>, vector<32x32xbf16>, vector<64x32xf32> -> vector<64x32xf32>
    %28 = arith.addf %20, %27 : vector<64x32xf32>
    %29 = vector.extract_strided_slice %1 {offsets = [24, 0], sizes = [64, 32], strides = [1, 1]} : vector<88x32xbf16> to vector<64x32xbf16>
    %30 = vector.extract_strided_slice %2 {offsets = [192, 0], sizes = [32, 32], strides = [1, 1]} : vector<224x32xbf16> to vector<32x32xbf16>
    %cst_11 = arith.constant dense<0.000000e+00> : vector<64x32xf32>
    %31 = tpu.matmul %29, %30, %cst_11 {dimension_numbers = #tpu.dot_dimension_numbers<[1], [0], [0], [1], [0, 0, 1, 1], [], []>} : vector<64x32xbf16>, vector<32x32xbf16>, vector<64x32xf32> -> vector<64x32xf32>
    %32 = arith.addf %24, %31 : vector<64x32xf32>
    %33 = vector.extract_strided_slice %1 {offsets = [0, 0], sizes = [64, 32], strides = [1, 1]} : vector<88x32xbf16> to vector<64x32xbf16>
    %34 = vector.extract_strided_slice %2 {offsets = [32, 0], sizes = [32, 32], strides = [1, 1]} : vector<224x32xbf16> to vector<32x32xbf16>
    %cst_12 = arith.constant dense<0.000000e+00> : vector<64x32xf32>
    %35 = tpu.matmul %33, %34, %cst_12 {dimension_numbers = #tpu.dot_dimension_numbers<[1], [0], [0], [1], [0, 0, 1, 1], [], []>} : vector<64x32xbf16>, vector<32x32xbf16>, vector<64x32xf32> -> vector<64x32xf32>
    %36 = arith.addf %28, %35 : vector<64x32xf32>
    %37 = vector.extract_strided_slice %0 {offsets = [8, 0], sizes = [64, 32], strides = [1, 1]} : vector<88x32xbf16> to vector<64x32xbf16>
    %38 = vector.extract_strided_slice %2 {offsets = [32, 0], sizes = [32, 32], strides = [1, 1]} : vector<224x32xbf16> to vector<32x32xbf16>
    %cst_13 = arith.constant dense<0.000000e+00> : vector<64x32xf32>
    %39 = tpu.matmul %37, %38, %cst_13 {dimension_numbers = #tpu.dot_dimension_numbers<[1], [0], [0], [1], [0, 0, 1, 1], [], []>} : vector<64x32xbf16>, vector<32x32xbf16>, vector<64x32xf32> -> vector<64x32xf32>
    %40 = arith.addf %32, %39 : vector<64x32xf32>
    %41 = vector.extract_strided_slice %1 {offsets = [8, 0], sizes = [64, 32], strides = [1, 1]} : vector<88x32xbf16> to vector<64x32xbf16>
    %42 = vector.extract_strided_slice %2 {offsets = [96, 0], sizes = [32, 32], strides = [1, 1]} : vector<224x32xbf16> to vector<32x32xbf16>
    %cst_14 = arith.constant dense<0.000000e+00> : vector<64x32xf32>
    %43 = tpu.matmul %41, %42, %cst_14 {dimension_numbers = #tpu.dot_dimension_numbers<[1], [0], [0], [1], [0, 0, 1, 1], [], []>} : vector<64x32xbf16>, vector<32x32xbf16>, vector<64x32xf32> -> vector<64x32xf32>
    %44 = arith.addf %36, %43 : vector<64x32xf32>
    %45 = vector.extract_strided_slice %0 {offsets = [16, 0], sizes = [64, 32], strides = [1, 1]} : vector<88x32xbf16> to vector<64x32xbf16>
    %46 = vector.extract_strided_slice %2 {offsets = [96, 0], sizes = [32, 32], strides = [1, 1]} : vector<224x32xbf16> to vector<32x32xbf16>
    %cst_15 = arith.constant dense<0.000000e+00> : vector<64x32xf32>
    %47 = tpu.matmul %45, %46, %cst_15 {dimension_numbers = #tpu.dot_dimension_numbers<[1], [0], [0], [1], [0, 0, 1, 1], [], []>} : vector<64x32xbf16>, vector<32x32xbf16>, vector<64x32xf32> -> vector<64x32xf32>
    %48 = arith.addf %40, %47 : vector<64x32xf32>
    %49 = vector.extract_strided_slice %1 {offsets = [16, 0], sizes = [64, 32], strides = [1, 1]} : vector<88x32xbf16> to vector<64x32xbf16>
    %50 = vector.extract_strided_slice %2 {offsets = [160, 0], sizes = [32, 32], strides = [1, 1]} : vector<224x32xbf16> to vector<32x32xbf16>
    %cst_16 = arith.constant dense<0.000000e+00> : vector<64x32xf32>
    %51 = tpu.matmul %49, %50, %cst_16 {dimension_numbers = #tpu.dot_dimension_numbers<[1], [0], [0], [1], [0, 0, 1, 1], [], []>} : vector<64x32xbf16>, vector<32x32xbf16>, vector<64x32xf32> -> vector<64x32xf32>
    %52 = arith.addf %44, %51 : vector<64x32xf32>
    %53 = vector.extract_strided_slice %0 {offsets = [24, 0], sizes = [64, 32], strides = [1, 1]} : vector<88x32xbf16> to vector<64x32xbf16>
    %54 = vector.extract_strided_slice %2 {offsets = [160, 0], sizes = [32, 32], strides = [1, 1]} : vector<224x32xbf16> to vector<32x32xbf16>
    %cst_17 = arith.constant dense<0.000000e+00> : vector<64x32xf32>
    %55 = tpu.matmul %53, %54, %cst_17 {dimension_numbers = #tpu.dot_dimension_numbers<[1], [0], [0], [1], [0, 0, 1, 1], [], []>} : vector<64x32xbf16>, vector<32x32xbf16>, vector<64x32xf32> -> vector<64x32xf32>
    %56 = arith.addf %48, %55 : vector<64x32xf32>
    %57 = arith.maximumf %52, %56 : vector<64x32xf32>
    %c0_18 = arith.constant 0 : index
    %c0_19 = arith.constant 0 : index
    %58 = vector.load %arg4[%c0_18, %c0_19] : memref<1x32xf32, #tpu.memory_space<vmem>>, vector<1x32xf32>
    %59 = vector.broadcast %58 : vector<1x32xf32> to vector<64x32xf32>
    %60 = arith.addf %57, %59 : vector<64x32xf32>
    %cst_20 = arith.constant 0.000000e+00 : f32
    %61 = vector.broadcast %cst_20 : f32 to vector<64x32xf32>
    %62 = arith.maximumf %60, %61 : vector<64x32xf32>
    %63 = arith.truncf %62 : vector<64x32xf32> to vector<64x32xbf16>
    %c0_21 = arith.constant 0 : index
    %c0_22 = arith.constant 0 : index
    %64 = vector.load %arg5[%c0_21, %c0_22] : memref<32x128xbf16, #tpu.memory_space<vmem>>, vector<32x128xbf16>
    %cst_23 = arith.constant dense<0.000000e+00> : vector<64x128xf32>
    %65 = tpu.matmul %63, %64, %cst_23 {dimension_numbers = #tpu.dot_dimension_numbers<[1], [0], [0], [1], [0, 0, 1, 1], [], []>} : vector<64x32xbf16>, vector<32x128xbf16>, vector<64x128xf32> -> vector<64x128xf32>
    %c0_24 = arith.constant 0 : index
    %c0_25 = arith.constant 0 : index
    %66 = vector.load %arg7[%c0_24, %c0_25] : memref<1x128xf32, #tpu.memory_space<vmem>>, vector<1x128xf32>
    %67 = vector.broadcast %66 : vector<1x128xf32> to vector<64x128xf32>
    %68 = arith.addf %65, %67 : vector<64x128xf32>
    %c0_26 = arith.constant 0 : index
    %c0_27 = arith.constant 0 : index
    %69 = vector.load %arg15[%c0_26, %c0_27] : memref<64x128xf32, #tpu.memory_space<vmem>>, vector<64x128xf32>
    tpu.vector_store %arg15[%c0_26, %c0_27], %68 {strides = array<i32>} : memref<64x128xf32, #tpu.memory_space<vmem>>, vector<64x128xf32>,
    %c0_28 = arith.constant 0 : index
    %c0_29 = arith.constant 0 : index
    %70 = vector.load %arg6[%c0_28, %c0_29] : memref<32x128xf32, #tpu.memory_space<vmem>>, vector<32x128xf32>
    %c0_30 = arith.constant 0 : index
    %c0_31 = arith.constant 0 : index
    %71 = vector.load %arg10[%c0_30, %c0_31] : memref<8x32xf32, #tpu.memory_space<vmem>>, vector<8x32xf32>
    %c0_32 = arith.constant 0 : index
    %c0_33 = arith.constant 0 : index
    %72 = vector.load %arg11[%c0_32, %c0_33] : memref<8x32xf32, #tpu.memory_space<vmem>>, vector<8x32xf32>
    %c0_i32 = arith.constant 0 : i32
    %c8_i32 = arith.constant 8 : i32
    %73 = arith.addi %c0_i32, %c8_i32 : i32
    %c1_i32 = arith.constant 1 : i32
    %74:2 = scf.for %arg16 = %c0_i32 to %73 step %c1_i32 iter_args(%arg17 = %71, %arg18 = %72) -> (vector<8x32xf32>, vector<8x32xf32>)  : i32 {
      %c8_i32_48 = arith.constant 8 : i32
      %94 = arith.muli %arg16, %c8_i32_48 : i32
      %95 = tpu.assume_multiple %94, 8 : i32
      %96 = arith.index_cast %95 : i32 to index
      %c0_49 = arith.constant 0 : index
      %97 = vector.load %arg15[%96, %c0_49] : memref<64x128xf32, #tpu.memory_space<vmem>>, vector<8x128xf32>
      %cst_50 = arith.constant dense<0.000000e+00> : vector<8x128xf32>
      %98 = tpu.matmul %arg17, %70, %cst_50 {dimension_numbers = #tpu.dot_dimension_numbers<[1], [0], [0], [1], [0, 0, 1, 1], [], []>} : vector<8x32xf32>, vector<32x128xf32>, vector<8x128xf32> -> vector<8x128xf32>
      %99 = arith.addf %97, %98 : vector<8x128xf32>
      %100 = arith.negf %99 : vector<8x128xf32>
      %101 = math.exp %100 : vector<8x128xf32>
      %cst_51 = arith.constant 1.000000e+00 : f32
      %102 = vector.broadcast %cst_51 : f32 to vector<8x128xf32>
      %103 = arith.addf %102, %101 : vector<8x128xf32>
      %104 = arith.divf %102, %103 : vector<8x128xf32>
      %105 = math.tanh %99 : vector<8x128xf32>
      %106 = vector.extract_strided_slice %104 {offsets = [0, 32], sizes = [8, 32], strides = [1, 1]} : vector<8x128xf32> to vector<8x32xf32>
      %107 = arith.mulf %106, %arg18 : vector<8x32xf32>
      %108 = vector.extract_strided_slice %104 {offsets = [0, 0], sizes = [8, 32], strides = [1, 1]} : vector<8x128xf32> to vector<8x32xf32>
      %109 = vector.extract_strided_slice %105 {offsets = [0, 64], sizes = [8, 32], strides = [1, 1]} : vector<8x128xf32> to vector<8x32xf32>
      %110 = arith.mulf %108, %109 : vector<8x32xf32>
      %111 = arith.addf %107, %110 : vector<8x32xf32>
      %112 = vector.extract_strided_slice %104 {offsets = [0, 96], sizes = [8, 32], strides = [1, 1]} : vector<8x128xf32> to vector<8x32xf32>
      %113 = math.tanh %111 : vector<8x32xf32>
      %114 = arith.mulf %112, %113 : vector<8x32xf32>
      scf.yield %114, %111 : vector<8x32xf32>, vector<8x32xf32>
    }
    %c8_i32_34 = arith.constant 8 : i32
    %c0_35 = arith.constant 0 : index
    %c0_36 = arith.constant 0 : index
    %75 = vector.load %arg13[%c0_35, %c0_36] : memref<8x32xf32, #tpu.memory_space<vmem>>, vector<8x32xf32>
    tpu.vector_store %arg13[%c0_35, %c0_36], %74#0 {strides = array<i32>} : memref<8x32xf32, #tpu.memory_space<vmem>>, vector<8x32xf32>,
    %c0_37 = arith.constant 0 : index
    %c0_38 = arith.constant 0 : index
    %76 = vector.load %arg14[%c0_37, %c0_38] : memref<8x32xf32, #tpu.memory_space<vmem>>, vector<8x32xf32>
    tpu.vector_store %arg14[%c0_37, %c0_38], %74#1 {strides = array<i32>} : memref<8x32xf32, #tpu.memory_space<vmem>>, vector<8x32xf32>,
    %c0_39 = arith.constant 0 : index
    %c0_40 = arith.constant 0 : index
    %77 = vector.load %arg8[%c0_39, %c0_40] : memref<32x2xf32, #tpu.memory_space<vmem>>, vector<32x2xf32>
    %cst_41 = arith.constant dense<0.000000e+00> : vector<8x2xf32>
    %78 = tpu.matmul %74#0, %77, %cst_41 {dimension_numbers = #tpu.dot_dimension_numbers<[1], [0], [0], [1], [0, 0, 1, 1], [], []>} : vector<8x32xf32>, vector<32x2xf32>, vector<8x2xf32> -> vector<8x2xf32>
    %c0_42 = arith.constant 0 : index
    %c0_43 = arith.constant 0 : index
    %79 = vector.load %arg9[%c0_42, %c0_43] : memref<1x2xf32, #tpu.memory_space<vmem>>, vector<1x2xf32>
    %80 = vector.broadcast %79 : vector<1x2xf32> to vector<8x2xf32>
    %81 = arith.addf %78, %80 : vector<8x2xf32>
    %cst_44 = arith.constant dense<0xFF800000> : vector<8xf32>
    %82 = vector.multi_reduction <maximumf>, %81, %cst_44 [1] : vector<8x2xf32> to vector<8xf32>
    %83 = vector.shape_cast %82 : vector<8xf32> to vector<8x1xf32>
    %84 = vector.broadcast %83 : vector<8x1xf32> to vector<8x2xf32>
    %85 = arith.subf %81, %84 : vector<8x2xf32>
    %86 = math.exp %85 : vector<8x2xf32>
    %cst_45 = arith.constant dense<0.000000e+00> : vector<8xf32>
    %87 = vector.multi_reduction <add>, %86, %cst_45 [1] : vector<8x2xf32> to vector<8xf32>
    %88 = vector.shape_cast %87 : vector<8xf32> to vector<8x1xf32>
    %89 = math.log %88 : vector<8x1xf32>
    %90 = arith.addf %83, %89 : vector<8x1xf32>
    %91 = vector.broadcast %90 : vector<8x1xf32> to vector<8x2xf32>
    %92 = arith.subf %81, %91 : vector<8x2xf32>
    %c0_46 = arith.constant 0 : index
    %c0_47 = arith.constant 0 : index
    %93 = vector.load %arg12[%c0_46, %c0_47] : memref<8x2xf32, #tpu.memory_space<vmem>>, vector<8x2xf32>
    tpu.vector_store %arg12[%c0_46, %c0_47], %92 {strides = array<i32>} : memref<8x2xf32, #tpu.memory_space<vmem>>, vector<8x2xf32>,
    return
  }
  func.func @transform_0(%arg0: i32) -> (i32, i32) {
    %c0_i32 = arith.constant 0 : i32
    %c0_i32_0 = arith.constant 0 : i32
    %c0_i32_1 = arith.constant 0 : i32
    return %c0_i32, %c0_i32_0 : i32, i32
  }
  func.func @transform_1(%arg0: i32) -> (i32, i32) {
    %c0_i32 = arith.constant 0 : i32
    %c0_i32_0 = arith.constant 0 : i32
    %c0_i32_1 = arith.constant 0 : i32
    return %c0_i32, %c0_i32_0 : i32, i32
  }
  func.func @transform_2(%arg0: i32) -> (i32, i32) {
    %c0_i32 = arith.constant 0 : i32
    %c0_i32_0 = arith.constant 0 : i32
    %c0_i32_1 = arith.constant 0 : i32
    return %c0_i32, %c0_i32_0 : i32, i32
  }
  func.func @transform_3(%arg0: i32) -> (i32, i32) {
    %c0_i32 = arith.constant 0 : i32
    %c0_i32_0 = arith.constant 0 : i32
    %c0_i32_1 = arith.constant 0 : i32
    return %c0_i32, %c0_i32_0 : i32, i32
  }
  func.func @transform_4(%arg0: i32) -> (i32, i32) {
    %c0_i32 = arith.constant 0 : i32
    %c0_i32_0 = arith.constant 0 : i32
    %c0_i32_1 = arith.constant 0 : i32
    return %c0_i32, %c0_i32_0 : i32, i32
  }
  func.func @transform_5(%arg0: i32) -> (i32, i32) {
    %c0_i32 = arith.constant 0 : i32
    %c0_i32_0 = arith.constant 0 : i32
    %c0_i32_1 = arith.constant 0 : i32
    return %c0_i32, %c0_i32_0 : i32, i32
  }
  func.func @transform_6(%arg0: i32) -> (i32, i32) {
    %c0_i32 = arith.constant 0 : i32
    %c0_i32_0 = arith.constant 0 : i32
    %c0_i32_1 = arith.constant 0 : i32
    return %c0_i32, %c0_i32_0 : i32, i32
  }
  func.func @transform_7(%arg0: i32) -> (i32, i32) {
    %c0_i32 = arith.constant 0 : i32
    %c0_i32_0 = arith.constant 0 : i32
    %c0_i32_1 = arith.constant 0 : i32
    return %c0_i32, %c0_i32_0 : i32, i32
  }
  func.func @transform_8(%arg0: i32) -> (i32, i32) {
    %c0_i32 = arith.constant 0 : i32
    %c0_i32_0 = arith.constant 0 : i32
    %c0_i32_1 = arith.constant 0 : i32
    return %c0_i32, %c0_i32_0 : i32, i32
  }
  func.func @transform_9(%arg0: i32) -> (i32, i32) {
    %c0_i32 = arith.constant 0 : i32
    %c0_i32_0 = arith.constant 0 : i32
    %c0_i32_1 = arith.constant 0 : i32
    return %c0_i32, %c0_i32_0 : i32, i32
  }
  func.func @transform_10(%arg0: i32) -> (i32, i32) {
    %c0_i32 = arith.constant 0 : i32
    %c0_i32_0 = arith.constant 0 : i32
    %c0_i32_1 = arith.constant 0 : i32
    return %c0_i32, %c0_i32_0 : i32, i32
  }
  func.func @transform_11(%arg0: i32) -> (i32, i32) {
    %c0_i32 = arith.constant 0 : i32
    %c0_i32_0 = arith.constant 0 : i32
    %c0_i32_1 = arith.constant 0 : i32
    return %c0_i32, %c0_i32_0 : i32, i32
  }
  func.func @transform_12(%arg0: i32) -> (i32, i32) {
    %c0_i32 = arith.constant 0 : i32
    %c0_i32_0 = arith.constant 0 : i32
    %c0_i32_1 = arith.constant 0 : i32
    return %c0_i32, %c0_i32_0 : i32, i32
  }
  func.func @transform_13(%arg0: i32) -> (i32, i32) {
    %c0_i32 = arith.constant 0 : i32
    %c0_i32_0 = arith.constant 0 : i32
    %c0_i32_1 = arith.constant 0 : i32
    return %c0_i32, %c0_i32_0 : i32, i32
  }
}

</mosaic_0001>

<bundles_post_ra>
// kernel: lstm_imdb_forward.1
= control target key start
LH: loop header
LB: loop body
LE: loop exit
PB: predicated region body
PF: predicated region fallthrough
CT: control target
= control target key end

     0   :  { %19 = vsyncpa [#allocation4], 0  ;;  %s3288_s0 = inlined_call_operand.hbm [shape: bf16[88,32], index: 0, kind: input, shape index: {}]   ;;  %s3289_s1 = inlined_call_operand.hbm [shape: bf16[88,32], index: 1, kind: input, shape index: {}]   ;;  %s3290_s2 = inlined_call_operand.hbm [shape: bf16[224,32], index: 2, kind: input, shape index: {}]   ;;  %s3291_s3 = inlined_call_operand.hbm [shape: f32[1,32], index: 3, kind: input, shape index: {}]   ;;  %s3292_s4 = inlined_call_operand.hbm [shape: bf16[32,128], index: 4, kind: input, shape index: {}]   ;;  %s3293_s5 = inlined_call_operand.hbm [shape: f32[32,128], index: 5, kind: input, shape index: {}]   ;;  %s3294_s6 = inlined_call_operand.hbm [shape: f32[1,128], index: 6, kind: input, shape index: {}]   ;;  %s3295_s7 = inlined_call_operand.hbm [shape: f32[32,2], index: 7, kind: input, shape index: {}]   ;;  %s3296_s8 = inlined_call_operand.hbm [shape: f32[1,2], index: 8, kind: input, shape index: {}]   ;;  %s3297_s9 = inlined_call_operand.hbm [shape: f32[8,32], index: 9, kind: input, shape index: {}]   ;;  %s3298_s10 = inlined_call_operand.hbm [shape: f32[8,32], index: 10, kind: input, shape index: {}]   ;;  %s3299_s11 = inlined_call_operand.hbm [shape: f32[8,2], index: 11, kind: output, shape index: {0}]   ;;  %s3300_s12 = inlined_call_operand.hbm [shape: f32[8,32], index: 12, kind: output, shape index: {1}]   ;;  %s3301_s13 = inlined_call_operand.hbm [shape: f32[8,32], index: 13, kind: output, shape index: {2}]  }
   0x1   :  { %20 = vsyncpa [#allocation7], 0 }
   0x2   :  { %21 = vsyncpa [#allocation10], 0 }
   0x3   :  { %22 = vsyncpa [#allocation13], 0 }
   0x4   :  { %23 = vsyncpa [#allocation16], 0 }
   0x5   :  { %24 = vsyncpa [#allocation19], 0 }
   0x6   :  { %25 = vsyncpa [#allocation5], 0 }
   0x7   :  { %26 = vsyncpa [#allocation23], 0  ;;  %s2827_s25 = smov [#allocation6]   ;;  %s2828_s27 = smov [#allocation9]  }
   0x8   :  { %s44_s26 = sshll.u32 %s2827_s25, 4  ;;  %s69_s28 = sshll.u32 %s2828_s27, 4  ;;  %s45_s26 = int_to_ptr.vmem [resolvable:$true] %s44_s26  ;;  %s2924_s28 = int_to_ptr.vmem [resolvable:$true] %s69_s28 }
   0x9   :  { %s2479_s14 = scalar_lea.hbm %s3289_s1, 704 }
   0xa   :  { %p2480_p0 = scmp.ne.s32.totalorder %s3289_s1, %s2479_s14  ;;  %p2483_p1 = scmp.lt.u32.totalorder %s2479_s14, %s3289_s1 }
   0xc   :  { %p2485_p2 = pnand %p2483_p1, %p2480_p0 }
   0xe   :  { %2488 = shalt.err (!%p2485_p2)
}
   0xf   :  { %s2489_s19 = scalar_lea.vmem %s45_s26, 704  ;;  %p2494_p4 = scmp.lt.s32.totalorder %s45_s26, %s45_s26 }
  0x10   :  { %p2490_p3 = scmp.ne.s32.totalorder %s45_s26, %s2489_s19  ;;  %p2495_p5 = scmp.lt.s32.totalorder %s2489_s19, %s2489_s19 }
  0x12   :  { %p2496_p6 = por %p2495_p5, %p2494_p4 }
  0x14   :  { %p2497_p7 = pnand %p2496_p6, %p2490_p3 }
  0x16   :  { %2500 = shalt.err (!%p2497_p7)
}
  0x17   :  { %s2829_s20 = smov 64   ;;  %s2830_s21 = smov 4  }
  0x18   :  { %50 = dma.hbm_to_vmem [thread:$0]  %s3289_s1, 704, %s45_s26, [#allocation7], %s2829_s20, %s2829_s20, %s2830_s21  }
  0x19   :  { %s2501_s27 = scalar_lea.hbm %s3291_s3, 16 }
  0x1a   :  { %p2502_p8 = scmp.ne.s32.totalorder %s3291_s3, %s2501_s27  ;;  %p2505_p9 = scmp.lt.u32.totalorder %s2501_s27, %s3291_s3 }
  0x1c   :  { %p2507_p10 = pnand %p2505_p9, %p2502_p8 }
  0x1e   :  { %2510 = shalt.err (!%p2507_p10)
}
  0x1f   :  { %s2511_s16 = scalar_lea.vmem %s2924_s28, 16  ;;  %s2515_s1 = scalar_lea.vmem %s2924_s28, 32 }
  0x20   :  { %p2512_p11 = scmp.ne.s32.totalorder %s2924_s28, %s2511_s16  ;;  %p2516_p12 = scmp.lt.s32.totalorder %s2924_s28, %s2924_s28 }
  0x21   :  { %p2517_p13 = scmp.lt.s32.totalorder %s2515_s1, %s2511_s16 }
  0x23   :  { %p2518_p0 = por %p2517_p13, %p2516_p12 }
  0x25   :  { %p2519_p1 = pnand %p2518_p0, %p2512_p11 }
  0x27   :  { %2522 = shalt.err (!%p2519_p1)
}
  0x28   :  { %72 = dma.hbm_to_vmem [thread:$0]  %s3291_s3, 16, %s2924_s28, [#allocation10]  }
  0x29   :  { %s2831_s18 = smov [#allocation12]   ;;  %s2523_s24 = scalar_lea.hbm %s3293_s5, 512 }
  0x2a   :  { %s90_s19 = sshll.u32 %s2831_s18, 4  ;;  %p2524_p2 = scmp.ne.s32.totalorder %s3293_s5, %s2523_s24  ;;  %s91_s19 = int_to_ptr.vmem [resolvable:$true] %s90_s19 }
  0x2b   :  { %p2527_p3 = scmp.lt.u32.totalorder %s2523_s24, %s3293_s5 }
  0x2d   :  { %p2529_p4 = pnand %p2527_p3, %p2524_p2 }
  0x2f   :  { %2532 = shalt.err (!%p2529_p4)
}
  0x30   :  { %s2533_s14 = scalar_lea.vmem %s91_s19, 512  ;;  %p2538_p6 = scmp.lt.s32.totalorder %s91_s19, %s91_s19 }
  0x31   :  { %p2534_p5 = scmp.ne.s32.totalorder %s91_s19, %s2533_s14  ;;  %p2539_p7 = scmp.lt.s32.totalorder %s2533_s14, %s2533_s14 }
  0x33   :  { %p2540_p8 = por %p2539_p7, %p2538_p6 }
  0x35   :  { %p2541_p9 = pnand %p2540_p8, %p2534_p5 }
  0x37   :  { %2544 = shalt.err (!%p2541_p9)
}
  0x38   :  { %s2832_s3 = smov 128   ;;  %s2833_s28 = smov 8  }
  0x39   :  { %96 = dma.hbm_to_vmem [thread:$0]  %s3293_s5, 512, %s91_s19, [#allocation13], %s2832_s3, %s2832_s3, %s2833_s28  }
  0x3a   :  { %s2834_s1 = smov [#allocation15]   ;;  %s2835_s17 = smov [#allocation18]  }
  0x3b   :  { %s112_s26 = sshll.u32 %s2834_s1, 4  ;;  %s135_s18 = sshll.u32 %s2835_s17, 4  ;;  %s113_s26 = int_to_ptr.vmem [resolvable:$true] %s112_s26  ;;  %s136_s18 = int_to_ptr.vmem [resolvable:$true] %s135_s18 }
  0x3c   :  { %s2545_s24 = scalar_lea.hbm %s3295_s7, 512 }
  0x3d   :  { %p2546_p10 = scmp.ne.s32.totalorder %s3295_s7, %s2545_s24  ;;  %p2549_p11 = scmp.lt.u32.totalorder %s2545_s24, %s3295_s7 }
  0x3f   :  { %p2551_p12 = pnand %p2549_p11, %p2546_p10 }
  0x41   :  { %2554 = shalt.err (!%p2551_p12)
}
  0x42   :  { %s2555_s5 = scalar_lea.vmem %s113_s26, 512  ;;  %p2560_p0 = scmp.lt.s32.totalorder %s113_s26, %s113_s26 }
  0x43   :  { %p2556_p13 = scmp.ne.s32.totalorder %s113_s26, %s2555_s5  ;;  %p2561_p1 = scmp.lt.s32.totalorder %s2555_s5, %s2555_s5 }
  0x45   :  { %p2562_p2 = por %p2561_p1, %p2560_p0 }
  0x47   :  { %p2563_p3 = pnand %p2562_p2, %p2556_p13 }
  0x49   :  { %2566 = shalt.err (!%p2563_p3)
}
  0x4a   :  { %118 = dma.hbm_to_vmem [thread:$0]  %s3295_s7, 512, %s113_s26, [#allocation16], %s2832_s3, %s2832_s3, %s2833_s28  }
  0x4b   :  { %s2567_s1 = scalar_lea.hbm %s3297_s9, 128 }
  0x4c   :  { %p2568_p4 = scmp.ne.s32.totalorder %s3297_s9, %s2567_s1  ;;  %p2571_p5 = scmp.lt.u32.totalorder %s2567_s1, %s3297_s9 }
  0x4e   :  { %p2573_p6 = pnand %p2571_p5, %p2568_p4 }
  0x50   :  { %2576 = shalt.err (!%p2573_p6)
}
  0x51   :  { %s2577_s25 = scalar_lea.vmem %s136_s18, 128  ;;  %p2582_p8 = scmp.lt.s32.totalorder %s136_s18, %s136_s18 }
  0x52   :  { %p2578_p7 = scmp.ne.s32.totalorder %s136_s18, %s2577_s25  ;;  %p2583_p9 = scmp.lt.s32.totalorder %s2577_s25, %s2577_s25 }
  0x54   :  { %p2584_p10 = por %p2583_p9, %p2582_p8 }
  0x56   :  { %p2585_p11 = pnand %p2584_p10, %p2578_p7 }
  0x58   :  { %2588 = shalt.err (!%p2585_p11)
}
  0x59   :  { %138 = dma.hbm_to_vmem [thread:$0]  %s3297_s9, 128, %s136_s18, [#allocation19]  }
  0x5a   :  { %s2836_s28 = smov [#allocation3]   ;;  %s2837_s27 = smov [#allocation8]  }
  0x5b   :  { %s32_s26 = sshll.u32 %s2836_s28, 4  ;;  %s56_s29 = sshll.u32 %s2837_s27, 4  ;;  %s33_s26 = int_to_ptr.vmem [resolvable:$true] %s32_s26  ;;  %s57_s29 = int_to_ptr.vmem [resolvable:$true] %s56_s29 }
  0x5c   :  { %s2589_s19 = scalar_lea.hbm %s3288_s0, 704 }
  0x5d   :  { %p2590_p12 = scmp.ne.s32.totalorder %s3288_s0, %s2589_s19  ;;  %p2593_p13 = scmp.lt.u32.totalorder %s2589_s19, %s3288_s0 }
  0x5f   :  { %p2595_p0 = pnand %p2593_p13, %p2590_p12 }
  0x61   :  { %2598 = shalt.err (!%p2595_p0)
}
  0x62   :  { %s2599_s9 = scalar_lea.vmem %s33_s26, 704  ;;  %p2604_p2 = scmp.lt.s32.totalorder %s33_s26, %s33_s26 }
  0x63   :  { %p2600_p1 = scmp.ne.s32.totalorder %s33_s26, %s2599_s9  ;;  %p2605_p3 = scmp.lt.s32.totalorder %s2599_s9, %s2599_s9 }
  0x65   :  { %p2606_p4 = por %p2605_p3, %p2604_p2 }
  0x67   :  { %p2607_p5 = pnand %p2606_p4, %p2600_p1 }
  0x69   :  { %2610 = shalt.err (!%p2607_p5)
}
  0x6a   :  { %38 = dma.hbm_to_vmem [thread:$0]  %s3288_s0, 704, %s33_s26, [#allocation4], %s2829_s20, %s2829_s20, %s2830_s21  }
  0x6b   :  { %s2611_s24 = scalar_lea.hbm %s3290_s2, 1792 }
  0x6c   :  { %p2612_p6 = scmp.ne.s32.totalorder %s3290_s2, %s2611_s24  ;;  %p2615_p7 = scmp.lt.u32.totalorder %s2611_s24, %s3290_s2 }
  0x6e   :  { %p2617_p8 = pnand %p2615_p7, %p2612_p6 }
  0x70   :  { %2620 = shalt.err (!%p2617_p8)
}
  0x71   :  { %s2621_s27 = scalar_lea.vmem %s57_s29, 1792  ;;  %p2626_p10 = scmp.lt.s32.totalorder %s57_s29, %s57_s29 }
  0x72   :  { %p2622_p9 = scmp.ne.s32.totalorder %s57_s29, %s2621_s27  ;;  %p2627_p11 = scmp.lt.s32.totalorder %s2621_s27, %s2621_s27 }
  0x74   :  { %p2628_p12 = por %p2627_p11, %p2626_p10 }
  0x76   :  { %p2629_p13 = pnand %p2628_p12, %p2622_p9 }
  0x78   :  { %2632 = shalt.err (!%p2629_p13)
}
  0x79   :  { %62 = dma.hbm_to_vmem [thread:$0]  %s3290_s2, 1792, %s57_s29, [#allocation7], %s2829_s20, %s2829_s20, %s2830_s21  }
  0x7a   :  { %s2838_s30 = smov [#allocation11]   ;;  %s2839_s19 = smov [#allocation14]  }
  0x7b   :  { %s78_s5 = sshll.u32 %s2838_s30, 4  ;;  %s103_s14 = sshll.u32 %s2839_s19, 4  ;;  %s79_s5 = int_to_ptr.vmem [resolvable:$true] %s78_s5  ;;  %s104_s14 = int_to_ptr.vmem [resolvable:$true] %s103_s14 }
  0x7c   :  { %s2633_s1 = scalar_lea.hbm %s3292_s4, 256 }
  0x7d   :  { %p2634_p0 = scmp.ne.s32.totalorder %s3292_s4, %s2633_s1  ;;  %p2637_p1 = scmp.lt.u32.totalorder %s2633_s1, %s3292_s4 }
  0x7f   :  { %p2639_p2 = pnand %p2637_p1, %p2634_p0 }
  0x81   :  { %2642 = shalt.err (!%p2639_p2)
}
  0x82   :  { %s2643_s2 = scalar_lea.vmem %s79_s5, 256  ;;  %p2648_p4 = scmp.lt.s32.totalorder %s79_s5, %s79_s5 }
  0x83   :  { %p2644_p3 = scmp.ne.s32.totalorder %s79_s5, %s2643_s2  ;;  %p2649_p5 = scmp.lt.s32.totalorder %s2643_s2, %s2643_s2 }
  0x85   :  { %p2650_p6 = por %p2649_p5, %p2648_p4 }
  0x87   :  { %p2651_p7 = pnand %p2650_p6, %p2644_p3 }
  0x89   :  { %2654 = shalt.err (!%p2651_p7)
}
  0x8a   :  { %84 = dma.hbm_to_vmem [thread:$0]  %s3292_s4, 256, %s79_s5, [#allocation10], %s2829_s20, %s2829_s20, %s2830_s21  }
  0x8b   :  { %s2655_s7 = scalar_lea.hbm %s3294_s6, 16 }
  0x8c   :  { %p2656_p8 = scmp.ne.s32.totalorder %s3294_s6, %s2655_s7  ;;  %p2659_p9 = scmp.lt.u32.totalorder %s2655_s7, %s3294_s6 }
  0x8e   :  { %p2661_p10 = pnand %p2659_p9, %p2656_p8 }
  0x90   :  { %2664 = shalt.err (!%p2661_p10)
}
  0x91   :  { %s2665_s26 = scalar_lea.vmem %s104_s14, 16  ;;  %s2669_s30 = scalar_lea.vmem %s104_s14, 32 }
  0x92   :  { %p2666_p11 = scmp.ne.s32.totalorder %s104_s14, %s2665_s26  ;;  %p2670_p12 = scmp.lt.s32.totalorder %s104_s14, %s104_s14 }
  0x93   :  { %p2671_p13 = scmp.lt.s32.totalorder %s2669_s30, %s2665_s26 }
  0x95   :  { %p2672_p0 = por %p2671_p13, %p2670_p12 }
  0x97   :  { %p2673_p1 = pnand %p2672_p0, %p2666_p11 }
  0x99   :  { %2676 = shalt.err (!%p2673_p1)
}
  0x9a   :  { %106 = dma.hbm_to_vmem [thread:$0]  %s3294_s6, 16, %s104_s14, [#allocation13]  }
  0x9b   :  { %s2840_s21 = smov [#allocation17]   ;;  %s2841_s19 = smov [#allocation20]  }
  0x9c   :  { %s125_s5 = sshll.u32 %s2840_s21, 4  ;;  %s145_s15 = sshll.u32 %s2841_s19, 4  ;;  %s126_s5 = int_to_ptr.vmem [resolvable:$true] %s125_s5  ;;  %s146_s15 = int_to_ptr.vmem [resolvable:$true] %s145_s15 }
  0x9d   :  { %s2677_s9 = scalar_lea.hbm %s3296_s8, 16 }
  0x9e   :  { %p2678_p2 = scmp.ne.s32.totalorder %s3296_s8, %s2677_s9  ;;  %p2681_p3 = scmp.lt.u32.totalorder %s2677_s9, %s3296_s8 }
  0xa0   :  { %p2683_p4 = pnand %p2681_p3, %p2678_p2 }
  0xa2   :  { %2686 = shalt.err (!%p2683_p4)
}
  0xa3   :  { %s2687_s6 = scalar_lea.vmem %s126_s5, 16  ;;  %s2691_s14 = scalar_lea.vmem %s126_s5, 32 }
  0xa4   :  { %p2688_p5 = scmp.ne.s32.totalorder %s126_s5, %s2687_s6  ;;  %p2692_p6 = scmp.lt.s32.totalorder %s126_s5, %s126_s5 }
  0xa5   :  { %p2693_p7 = scmp.lt.s32.totalorder %s2691_s14, %s2687_s6 }
  0xa7   :  { %p2694_p8 = por %p2693_p7, %p2692_p6 }
  0xa9   :  { %p2695_p9 = pnand %p2694_p8, %p2688_p5 }
  0xab   :  { %2698 = shalt.err (!%p2695_p9)
}
  0xac   :  { %128 = dma.hbm_to_vmem [thread:$0]  %s3296_s8, 16, %s126_s5, [#allocation16]  }
  0xad   :  { %s2699_s7 = scalar_lea.hbm %s3298_s10, 128 }
  0xae   :  { %p2700_p10 = scmp.ne.s32.totalorder %s3298_s10, %s2699_s7  ;;  %p2703_p11 = scmp.lt.u32.totalorder %s2699_s7, %s3298_s10 }
  0xb0   :  { %p2705_p12 = pnand %p2703_p11, %p2700_p10 }
  0xb2   :  { %2708 = shalt.err (!%p2705_p12)
}
  0xb3   :  { %s2709_s26 = scalar_lea.vmem %s146_s15, 128  ;;  %p2714_p0 = scmp.lt.s32.totalorder %s146_s15, %s146_s15 }
  0xb4   :  { %p2710_p13 = scmp.ne.s32.totalorder %s146_s15, %s2709_s26  ;;  %p2715_p1 = scmp.lt.s32.totalorder %s2709_s26, %s2709_s26 }
  0xb6   :  { %p2716_p2 = por %p2715_p1, %p2714_p0 }
  0xb8   :  { %p2717_p3 = pnand %p2716_p2, %p2710_p13 }
  0xba   :  { %2720 = shalt.err (!%p2717_p3)
}
  0xbb   :  { %148 = dma.hbm_to_vmem [thread:$0]  %s3298_s10, 128, %s146_s15, [#allocation19]  }
  0xbc   :  { %2799 = dma.done.wait [#allocation4], 704  }
  0xbd   :  { %2800 = vsyncadd [#allocation4], 4294966592 }
  0xbe   :  { %2801 = dma.done.wait [#allocation7], 2496  }
  0xbf   :  { %2802 = vsyncadd [#allocation7], 4294964800 }
  0xc0   :  { %2803 = dma.done.wait [#allocation10], 272  }
  0xc1   :  { %2804 = vsyncadd [#allocation10], 4294967024 }
  0xc2   :  { %2805 = dma.done.wait [#allocation13], 528  }
  0xc3   :  { %2806 = vsyncadd [#allocation13], 4294966768 }
  0xc4   :  { %2807 = dma.done.wait [#allocation16], 528  }
  0xc5   :  { %2808 = vsyncadd [#allocation16], 4294966768 }
  0xc6   :  { %2809 = dma.done.wait [#allocation19], 256  }
  0xc7   :  { %2810 = vsyncadd [#allocation19], 4294967040  ;;  %v3076_v0 = vld [vmem:[#allocation12] sm:$0xff]  ;;  %v3078_v1 = vld [vmem:[#allocation12 + $0x8] sm:$0xff]  ;;  %vm265_vm0 = vcmask 261120   ;;  %s3232_s10 = smov 0  }
  0xc8   :  { %v3080_v2 = vld [vmem:[#allocation12 + $0x10] sm:$0xff]  ;;  %v3082_v3 = vld [vmem:[#allocation12 + $0x18] sm:$0xff]  ;;  %v3084_v4 = vld [vmem:[#allocation18] sm:$0xff]  }
  0xc9   :  { %v3086_v5 = vld [vmem:[#allocation20] sm:$0xff]   ;;  %v2431_v6 = vld [vmem:[#allocation8 + $0x20] sm:$0xff]   ;;  %v187_v11 = vld [vmem:[#allocation3 + $0x10] sm:$0xf] }
  0xca   :  { %v2432_v7 = vld [vmem:[#allocation8 + $0x28] sm:$0xff]   ;;  %2066 = vmatprep.subr.bf16.mxu0 %v2431_v6  ;;  %2280 = vmatprep.subr.bf16.mxu1 %v2431_v6  ;;  %v185_v9 = vld [vmem:[#allocation3 + $0x8] sm:$0xf]  ;;  %v186_v10 = vld [vmem:[#allocation3 + $0xc] sm:$0xf] }
  0xcb   :  { %v184_v8 = vld [vmem:[#allocation3 + $0x4] sm:$0xf]  ;;  %2067 = vmatpush3.bf16.msra.mxu0 %v2431_v6  ;;  %2282 = vmatpush3.bf16.msra.mxu1 %v2431_v6  ;;  %v188_v13 = vld [vmem:[#allocation3 + $0x14] sm:$0xf]  ;;  %v189_v14 = vld [vmem:[#allocation3 + $0x18] sm:$0xf]  ;;  %v3096_v20 = vcombine.low %v186_v10, %v187_v11  ;;  %v3116_v34 = vcombine.low %v185_v9, %v186_v10 }
  0xcc   :  { %v3088_v12 = vcombine.low %v184_v8, %v185_v9  ;;  %2068 = vmatprep.subr.bf16.mxu0 %v2432_v7  ;;  %2281 = vmatprep.subr.bf16.mxu1 %v2432_v7  ;;  %v190_v15 = vld [vmem:[#allocation3 + $0x1c] sm:$0xf]  ;;  %v3090_v16 = vld [vmem:[#allocation3 + $0x20] sm:$0xf]  ;;  %v3094_v17 = vcombine.low %v188_v13, %v189_v14  ;;  %v195_v22 = vld [vmem:[#allocation6 + $0x4] sm:$0xf]  ;;  %v3122_v37 = vcombine.low %v187_v11, %v188_v13 }
  0xcd   :  { %v2439_v18 = vld [vmem:[#allocation8] sm:$0xff]   ;;  %v183_v19 = vld [vmem:[#allocation3] sm:$0xf]  ;;  %v3099_v21 = vcombine.low %v190_v15, %v3090_v16  ;;  %v196_v23 = vld [vmem:[#allocation6 + $0x8] sm:$0xf]  ;;  %v3132_v43 = vcombine.low %v189_v14, %v190_v15 }
  0xce   :  { %2070 = vmatprep.mubr.msk.bf16.mxu0 %vm265_vm0, %v3088_v12  ;;  %2074 = vmatprep.mubr.msk.bf16.mxu1 %vm265_vm0, %v3094_v17  ;;  %v3103_v24 = vcombine.low %v195_v22, %v196_v23  ;;  %v1873_v25 = vcombine.low %v183_v19, %v184_v8  ;;  %v197_v26 = vld [vmem:[#allocation6 + $0xc] sm:$0xf]  ;;  %v2443_v27 = vld [vmem:[#allocation8 + $0x8] sm:$0xff]   ;;  %v198_v28 = vld [vmem:[#allocation6 + $0x10] sm:$0xf] }
  0xcf   :  { %2069 = vmatpush3.bf16.msra.mxu0 %v2432_v7  ;;  %2283 = vmatpush3.bf16.msra.mxu1 %v2432_v7  ;;  %v199_v29 = vld [vmem:[#allocation6 + $0x14] sm:$0xf]  ;;  %v200_v30 = vld [vmem:[#allocation6 + $0x18] sm:$0xf]  ;;  %v2448_v31 = vld [vmem:[#allocation8 + $0x40] sm:$0xff]   ;;  %v3112_v32 = vcombine.low %v197_v26, %v198_v28  ;;  %v3135_v44 = vcombine.low %v196_v23, %v197_v26 }
  0xd0   :  { %2090 = vmatprep.subr.bf16.mxu1 %v2431_v6  ;;  %2078 = vmatprep.subr.bf16.mxu0 %v2439_v18  ;;  %v3114_v33 = vcombine.low %v199_v29, %v200_v30  ;;  %v201_v35 = vld [vmem:[#allocation6 + $0x1c] sm:$0xf]  ;;  %v202_v36 = vld [vmem:[#allocation6 + $0x20] sm:$0xf]  ;;  %v2450_v39 = vld [vmem:[#allocation8 + $0x48] sm:$0xff]   ;;  %v3141_v45 = vcombine.low %v198_v28, %v199_v29 }
  0xd1   :  { %v194_v38 = vld [vmem:[#allocation6] sm:$0xf]  ;;  %v3126_v40 = vcombine.low %v201_v35, %v202_v36  ;;  %v2454_v42 = vld [vmem:[#allocation8 + $0x60] sm:$0xff]   ;;  %v2455_v46 = vld [vmem:[#allocation8 + $0x68] sm:$0xff]   ;;  %v3149_v47 = vcombine.low %v200_v30, %v201_v35 }
  0xd2   :  { %2071 = vmatmul.mubr.msk.bf16.vlgmr.msra.gmra.mrb[0].mxu0 %vm265_vm0, %v3096_v20  ;;  %2075 = vmatmul.mubr.msk.bf16.vlgmr.msra.gmra.mrb[0].mxu1 %vm265_vm0, %v3099_v21  ;;  %v1891_v41 = vcombine.low %v194_v38, %v195_v22  ;;  %v192_v48 = vld [vmem:[#allocation3 + $0x24] sm:$0xf]  ;;  %v2458_v49 = vld [vmem:[#allocation8 + $0x10] sm:$0xff]   ;;  %v203_v51 = vld [vmem:[#allocation6 + $0x24] sm:$0xf] }
  0xd3   :  { %2091 = vmatpush3.bf16.msra.mxu1 %v2431_v6  ;;  %2079 = vmatpush3.bf16.msra.mxu0 %v2439_v18  ;;  %v3156_v50 = vcombine.low %v3090_v16, %v192_v48  ;;  %v2459_v52 = vld [vmem:[#allocation8 + $0x18] sm:$0xff]   ;;  %v1906_v53 = vcombine.low %v202_v36, %v203_v51  ;;  %v193_v54 = vld [vmem:[#allocation3 + $0x28] sm:$0xf] }
  0xd4   :  { %2092 = vmatprep.subr.bf16.mxu1 %v2432_v7  ;;  %2094 = vmatprep.mubr.msk.bf16.mxu1 %vm265_vm0, %v3103_v24  ;;  %v2461_v55 = vld [vmem:[#allocation8 + $0x30] sm:$0xff]   ;;  %v1911_v56 = vcombine.low %v192_v48, %v193_v54  ;;  %v204_v57 = vld [vmem:[#allocation6 + $0x28] sm:$0xf] }
  0xd5   :  { %2080 = vmatprep.subr.bf16.mxu0 %v2443_v27  ;;  %2082 = vmatprep.mubr.msk.bf16.mxu0 %vm265_vm0, %v1873_v25  ;;  %v2462_v58 = vld [vmem:[#allocation8 + $0x38] sm:$0xff]   ;;  %v1918_v59 = vcombine.low %v203_v51, %v204_v57  ;;  %v2463_v60 = vld [vmem:[#allocation8 + $0x50] sm:$0xff]  }
  0xd6   :  { %v2464_v61 = vld [vmem:[#allocation8 + $0x58] sm:$0xff]   ;;  %v1953_v23 = vld [vmem:[#allocation9] ss:$0 sm:$0xff] }
  0xd7   :  { %2093 = vmatpush3.bf16.msra.mxu1 %v2432_v7  ;;  %2081 = vmatpush3.bf16.msra.mxu0 %v2443_v27  ;;  %v2465_v62 = vld [vmem:[#allocation11] sm:$0xff]   ;;  %v2466_v63 = vld [vmem:[#allocation11 + $0x8] sm:$0xff]  }
  0xd8   :  { %2102 = vmatprep.subr.bf16.mxu1 %v2439_v18  ;;  %2114 = vmatprep.subr.bf16.mxu0 %v2448_v31 }
  0xda   :  { %2095 = vmatmul.mubr.msk.bf16.vlgmr.msra.gmra.mrb[4].mxu1 %vm265_vm0, %v3112_v32 }
  0xdb   :  { %2103 = vmatpush3.bf16.msra.mxu1 %v2439_v18  ;;  %2098 = vmatprep.mubr.msk.bf16.mxu1 %vm265_vm0, %v3114_v33 }
  0xdc   :  { %2104 = vmatprep.subr.bf16.mxu1 %v2443_v27 }
  0xde   :  { %2083 = vmatmul.mubr.msk.bf16.vlgmr.msra.gmra.mrb[0].mxu0 %vm265_vm0, %v3116_v34 }
  0xdf   :  { %2105 = vmatpush3.bf16.msra.mxu1 %v2443_v27  ;;  %2086 = vmatprep.mubr.msk.bf16.mxu0 %vm265_vm0, %v3122_v37 }
  0xe0   :  { %2115 = vmatpush3.bf16.msra.mxu0 %v2448_v31  ;;  %2126 = vmatprep.subr.bf16.mxu1 %v2448_v31 }
  0xe1   :  { %2116 = vmatprep.subr.bf16.mxu0 %v2450_v39 }
  0xe2   :  { %2099 = vmatmul.mubr.msk.bf16.gmra.mrb[8].mxu1 %vm265_vm0, %v3126_v40 }
  0xe3   :  { %2106 = vmatprep.mubr.msk.bf16.mxu1 %vm265_vm0, %v1891_v41 }
  0xe4   :  { %2117 = vmatpush3.bf16.msra.mxu0 %v2450_v39 }
  0xe5   :  { %2138 = vmatprep.subr.bf16.mxu0 %v2454_v42 }
  0xe6   :  { %2087 = vmatmul.mubr.msk.bf16.gmra.mrb[4].mxu0 %vm265_vm0, %v3132_v43 }
  0xe7   :  { %2118 = vmatprep.mubr.msk.bf16.mxu0 %vm265_vm0, %v3116_v34 }
  0xea   :  { %2107 = vmatmul.mubr.msk.bf16.vlgmr.msra.gmra.mrb[4].mxu1 %vm265_vm0, %v3135_v44 }
  0xeb   :  { %2127 = vmatpush3.bf16.msra.mxu1 %v2448_v31  ;;  %2110 = vmatprep.mubr.msk.bf16.mxu1 %vm265_vm0, %v3141_v45 }
  0xec   :  { %2128 = vmatprep.subr.bf16.mxu1 %v2450_v39 }
  0xee   :  { %2119 = vmatmul.mubr.msk.bf16.vlgmr.msra.gmra.mrb[0].mxu0 %vm265_vm0, %v3122_v37 }
  0xef   :  { %2129 = vmatpush3.bf16.msra.mxu1 %v2450_v39  ;;  %2122 = vmatprep.mubr.msk.bf16.mxu0 %vm265_vm0, %v3132_v43 }
  0xf0   :  { %2139 = vmatpush3.bf16.msra.mxu0 %v2454_v42  ;;  %2150 = vmatprep.subr.bf16.mxu1 %v2454_v42 }
  0xf1   :  { %2140 = vmatprep.subr.bf16.mxu0 %v2455_v46 }
  0xf2   :  { %2111 = vmatmul.mubr.msk.bf16.gmra.mrb[8].mxu1 %vm265_vm0, %v3149_v47 }
  0xf3   :  { %2130 = vmatprep.mubr.msk.bf16.mxu1 %vm265_vm0, %v3135_v44 }
  0xf4   :  { %2141 = vmatpush3.bf16.msra.mxu0 %v2455_v46 }
  0xf5   :  { %2162 = vmatprep.subr.bf16.mxu0 %v2458_v49 }
  0xf6   :  { %2123 = vmatmul.mubr.msk.bf16.gmra.mrb[4].mxu0 %vm265_vm0, %v3156_v50 }
  0xf7   :  { %2142 = vmatprep.mubr.msk.bf16.mxu0 %vm265_vm0, %v3096_v20 }
  0xfa   :  { %2131 = vmatmul.mubr.msk.bf16.vlgmr.msra.gmra.mrb[4].mxu1 %vm265_vm0, %v3141_v45 }
  0xfb   :  { %2151 = vmatpush3.bf16.msra.mxu1 %v2454_v42  ;;  %2134 = vmatprep.mubr.msk.bf16.mxu1 %vm265_vm0, %v3149_v47 }
  0xfc   :  { %2152 = vmatprep.subr.bf16.mxu1 %v2455_v46 }
  0xfe   :  { %2143 = vmatmul.mubr.msk.bf16.vlgmr.msra.gmra.mrb[0].mxu0 %vm265_vm0, %v3094_v17 }
  0xff   :  { %2153 = vmatpush3.bf16.msra.mxu1 %v2455_v46  ;;  %2146 = vmatprep.mubr.msk.bf16.mxu0 %vm265_vm0, %v3099_v21 }
 0x100   :  { %2163 = vmatpush3.bf16.msra.mxu0 %v2458_v49  ;;  %2174 = vmatprep.subr.bf16.mxu1 %v2458_v49 }
 0x101   :  { %2164 = vmatprep.subr.bf16.mxu0 %v2459_v52 }
 0x102   :  { %2135 = vmatmul.mubr.msk.bf16.gmra.mrb[8].mxu1 %vm265_vm0, %v1906_v53 }
 0x103   :  { %2154 = vmatprep.mubr.msk.bf16.mxu1 %vm265_vm0, %v3112_v32 }
 0x104   :  { %2165 = vmatpush3.bf16.msra.mxu0 %v2459_v52 }
 0x105   :  { %2186 = vmatprep.subr.bf16.mxu0 %v2461_v55 }
 0x106   :  { %2147 = vmatmul.mubr.msk.bf16.gmra.mrb[4].mxu0 %vm265_vm0, %v1911_v56 }
 0x107   :  { %2166 = vmatprep.mubr.msk.bf16.mxu0 %vm265_vm0, %v1891_v41 }
 0x10a   :  { %2155 = vmatmul.mubr.msk.bf16.vlgmr.msra.gmra.mrb[4].mxu1 %vm265_vm0, %v3114_v33 }
 0x10b   :  { %2175 = vmatpush3.bf16.msra.mxu1 %v2458_v49  ;;  %2158 = vmatprep.mubr.msk.bf16.mxu1 %vm265_vm0, %v3126_v40 }
 0x10c   :  { %2176 = vmatprep.subr.bf16.mxu1 %v2459_v52 }
 0x10e   :  { %2167 = vmatmul.mubr.msk.bf16.vlgmr.msra.gmra.mrb[0].mxu0 %vm265_vm0, %v3135_v44 }
 0x10f   :  { %2177 = vmatpush3.bf16.msra.mxu1 %v2459_v52  ;;  %2170 = vmatprep.mubr.msk.bf16.mxu0 %vm265_vm0, %v3141_v45 }
 0x110   :  { %2187 = vmatpush3.bf16.msra.mxu0 %v2461_v55  ;;  %2198 = vmatprep.subr.bf16.mxu1 %v2461_v55 }
 0x111   :  { %2188 = vmatprep.subr.bf16.mxu0 %v2462_v58 }
 0x112   :  { %2159 = vmatmul.mubr.msk.bf16.gmra.mrb[8].mxu1 %vm265_vm0, %v1918_v59  ;;  %v1954_v59 = vld [vmem:[#allocation14] ss:$0 sm:$0xff] }
 0x113   :  { %2178 = vmatprep.mubr.msk.bf16.mxu1 %vm265_vm0, %v3088_v12 }
 0x114   :  { %2189 = vmatpush3.bf16.msra.mxu0 %v2462_v58 }
 0x115   :  { %2210 = vmatprep.subr.bf16.mxu0 %v2463_v60 }
 0x116   :  { %2171 = vmatmul.mubr.msk.bf16.gmra.mrb[4].mxu0 %vm265_vm0, %v3149_v47 }
 0x117   :  { %2190 = vmatprep.mubr.msk.bf16.mxu0 %vm265_vm0, %v3103_v24 }
 0x11a   :  { %2179 = vmatmul.mubr.msk.bf16.vlgmr.msra.gmra.mrb[4].mxu1 %vm265_vm0, %v3096_v20 }
 0x11b   :  { %2199 = vmatpush3.bf16.msra.mxu1 %v2461_v55  ;;  %2182 = vmatprep.mubr.msk.bf16.mxu1 %vm265_vm0, %v3094_v17 }
 0x11c   :  { %2200 = vmatprep.subr.bf16.mxu1 %v2462_v58 }
 0x11e   :  { %2191 = vmatmul.mubr.msk.bf16.vlgmr.msra.gmra.mrb[0].mxu0 %vm265_vm0, %v3112_v32 }
 0x11f   :  { %2201 = vmatpush3.bf16.msra.mxu1 %v2462_v58  ;;  %2194 = vmatprep.mubr.msk.bf16.mxu0 %vm265_vm0, %v3114_v33 }
 0x120   :  { %2211 = vmatpush3.bf16.msra.mxu0 %v2463_v60  ;;  %2222 = vmatprep.subr.bf16.mxu1 %v2463_v60 }
 0x121   :  { %2212 = vmatprep.subr.bf16.mxu0 %v2464_v61 }
 0x122   :  { %2183 = vmatmul.mubr.msk.bf16.gmra.mrb[8].mxu1 %vm265_vm0, %v3099_v21 }
 0x123   :  { %2202 = vmatprep.mubr.msk.bf16.mxu1 %vm265_vm0, %v3116_v34 }
 0x124   :  { %2213 = vmatpush3.bf16.msra.mxu0 %v2464_v61 }
 0x125   :  { %2234 = vmatprep.subr.bf16.mxu0 %v2465_v62 }
 0x126   :  { %2195 = vmatmul.mubr.msk.bf16.gmra.mrb[4].mxu0 %vm265_vm0, %v3126_v40 }
 0x127   :  { %2214 = vmatprep.mubr.msk.bf16.mxu0 %vm265_vm0, %v3135_v44 }
 0x12a   :  { %2203 = vmatmul.mubr.msk.bf16.vlgmr.msra.gmra.mrb[4].mxu1 %vm265_vm0, %v3122_v37 }
 0x12b   :  { %2223 = vmatpush3.bf16.msra.mxu1 %v2463_v60  ;;  %2206 = vmatprep.mubr.msk.bf16.mxu1 %vm265_vm0, %v3132_v43 }
 0x12c   :  { %2224 = vmatprep.subr.bf16.mxu1 %v2464_v61 }
 0x12e   :  { %2215 = vmatmul.mubr.msk.bf16.vlgmr.msra.gmra.mrb[0].mxu0 %vm265_vm0, %v3141_v45 }
 0x12f   :  { %2225 = vmatpush3.bf16.msra.mxu1 %v2464_v61  ;;  %2218 = vmatprep.mubr.msk.bf16.mxu0 %vm265_vm0, %v3149_v47 }
 0x130   :  { %2235 = vmatpush3.bf16.msra.mxu0 %v2465_v62 }
 0x131   :  { %2236 = vmatprep.subr.bf16.mxu0 %v2466_v63 }
 0x132   :  { %2207 = vmatmul.mubr.msk.bf16.gmra.mrb[8].mxu1 %vm265_vm0, %v3156_v50 }
 0x133   :  { %2226 = vmatprep.mubr.msk.bf16.mxu1 %vm265_vm0, %v3096_v20 }
 0x134   :  { %2237 = vmatpush3.bf16.msra.mxu0 %v2466_v63 }
 0x136   :  { %2219 = vmatmul.mubr.msk.bf16.gmra.mrb[4].mxu0 %vm265_vm0, %v1906_v53 }
 0x13a   :  { %2227 = vmatmul.mubr.msk.bf16.vlgmr.msra.gmra.mrb[4].mxu1 %vm265_vm0, %v3094_v17 }
 0x13b   :  { %2230 = vmatprep.mubr.msk.bf16.mxu1 %vm265_vm0, %v3099_v21 }
 0x142   :  { %2231 = vmatmul.mubr.msk.bf16.gmra.mrb[8].mxu1 %vm265_vm0, %v1911_v56 }
 0x1a5   :  { %v2076_v6 = vpop.f32.mrb[0].mxu1 }
 0x1a6   :  { %v328_v7 = vpop.f32.mrb[1].mxu1 }
 0x1a7   :  { %v2077_v8 = vpop.f32.mrb[2].mxu1 }
 0x1a8   :  { %v331_v9 = vpop.f32.mrb[3].mxu1 }
 0x201   :  { %v2216_v10 = vpop.f32.mrb[0].mxu0 }
 0x202   :  { %v1320_v11 = vpop.f32.mrb[1].mxu0 }
 0x203   :  { %v2217_v12 = vpop.f32.mrb[2].mxu0 }
 0x204   :  { %v1323_v13 = vpop.f32.mrb[3].mxu0 }
 0x209   :  { %v2220_v14 = vpop.f32.mrb[4].mxu0 }
 0x20a   :  { %v2284_v15 = vadd.f32 %v2220_v14, %v2076_v6  ;;  %v1336_v16 = vpop.f32.mrb[5].mxu0 }
 0x20b   :  { %v2285_v17 = vadd.f32 %v1336_v16, %v328_v7  ;;  %v2221_v18 = vpop.f32.mrb[6].mxu0 }
 0x20c   :  { %v2286_v19 = vadd.f32 %v2221_v18, %v2077_v8  ;;  %v1339_v20 = vpop.f32.mrb[7].mxu0  ;;  %v2815_v18 = vmov %v3086_v5  }
 0x20d   :  { %v2287_v21 = vadd.f32 %v1339_v20, %v331_v9  ;;  %v2228_v22 = vpop.f32.mrb[4].mxu1 }
 0x20e   :  { %v1434_v24 = vmax.f32 %v2216_v10, %v2228_v22  ;;  %v1393_v25 = vpop.f32.mrb[5].mxu1 }
 0x20f   :  { %v1432_v26 = vmax.f32 %v1320_v11, %v1393_v25  ;;  %v2229_v27 = vpop.f32.mrb[6].mxu1 }
 0x210   :  { %v1449_v28 = vadd.f32 %v1953_v23, %v1434_v24  ;;  %v1435_v29 = vmax.f32 %v2217_v12, %v2229_v27  ;;  %v1396_v30 = vpop.f32.mrb[7].mxu1 }
 0x211   :  { %v1447_v31 = vadd.f32 %v1953_v23, %v1432_v26  ;;  %v1433_v32 = vmax.f32 %v1323_v13, %v1396_v30 }
 0x212   :  { %v1450_v33 = vadd.f32 %v1953_v23, %v1435_v29  ;;  %v1457_v35 = vmax.f32 %v1449_v28, 0.0 }
 0x213   :  { %v1448_v34 = vadd.f32 %v1953_v23, %v1433_v32  ;;  %v1455_v37 = vmax.f32 %v1447_v31, 0.0 }
 0x214   :  { %v1458_v36 = vmax.f32 %v1450_v33, 0.0 }
 0x215   :  { %v1456_v38 = vmax.f32 %v1448_v34, 0.0  ;;  %v2232_v39 = vpop.f32.mrb[8].mxu1 }
 0x216   :  { %v1464_v40 = vpack.c.bf16 %v1458_v36, %v1457_v35  ;;  %v1438_v41 = vmax.f32 %v2284_v15, %v2232_v39  ;;  %v1409_v42 = vpop.f32.mrb[9].mxu1 }
 0x217   :  { %v1463_v43 = vpack.c.bf16 %v1456_v38, %v1455_v37  ;;  %v1436_v44 = vmax.f32 %v2285_v17, %v1409_v42  ;;  %v2233_v45 = vpop.f32.mrb[10].mxu1 }
 0x218   :  { %v1453_v46 = vadd.f32 %v1953_v23, %v1438_v41  ;;  %v1439_v47 = vmax.f32 %v2286_v19, %v2233_v45  ;;  %v1412_v48 = vpop.f32.mrb[11].mxu1  ;;  %v2819_v19 = vmov %v3084_v4  }
 0x219   :  { %v1451_v49 = vadd.f32 %v1953_v23, %v1436_v44  ;;  %v1437_v50 = vmax.f32 %v2287_v21, %v1412_v48  ;;  %2238 = vmatprep.mubr.msk.bf16.mxu0 %vm265_vm0, %v1463_v43 }
 0x21a   :  { %v1454_v51 = vadd.f32 %v1953_v23, %v1439_v47  ;;  %2239 = vmatmul.mubr.msk.bf16.vlgmr.msra.gmra.mrb[8].mxu0 %vm265_vm0, %v1464_v40  ;;  %v1461_v53 = vmax.f32 %v1453_v46, 0.0 }
 0x21b   :  { %v1452_v52 = vadd.f32 %v1953_v23, %v1437_v50  ;;  %v1459_v55 = vmax.f32 %v1451_v49, 0.0 }
 0x21c   :  { %v1462_v54 = vmax.f32 %v1454_v51, 0.0 }
 0x21d   :  { %v1460_v56 = vmax.f32 %v1452_v52, 0.0 }
 0x21e   :  { %v1466_v57 = vpack.c.bf16 %v1462_v54, %v1461_v53 }
 0x21f   :  { %v1465_v58 = vpack.c.bf16 %v1460_v56, %v1459_v55 }
 0x221   :  { %2242 = vmatprep.mubr.msk.bf16.mxu0 %vm265_vm0, %v1465_v58 }
 0x222   :  { %2243 = vmatmul.mubr.msk.bf16.gmra.mrb[12].mxu0 %vm265_vm0, %v1466_v57 }
 0x2ed   :  { %v2240_v60 = vpop.f32.mrb[8].mxu0 }
 0x2ee   :  { %v1545_v61 = vadd.f32 %v2240_v60, %v1954_v59  ;;  %v1536_v62 = vpop.f32.mrb[9].mxu0 }
 0x2ef   :  { %v1537_v63 = vadd.f32 %v1954_v59, %v1536_v62  ;;  %v2241_v6 = vpop.f32.mrb[10].mxu0 }
 0x2f0   :  { %1569 = vst [vmem:[#allocation2 + $0x10] sm:$0xff] %v1545_v61  ;;  %v1548_v7 = vadd.f32 %v2241_v6, %v1954_v59  ;;  %v1539_v8 = vpop.f32.mrb[11].mxu0 }
 0x2f1   :  { %1567 = vst [vmem:[#allocation2] sm:$0xff] %v1537_v63  ;;  %v1540_v9 = vadd.f32 %v1954_v59, %v1539_v8 }
 0x2f2   :  { %1570 = vst [vmem:[#allocation2 + $0x18] sm:$0xff] %v1548_v7 }
 0x2f3   :  { %1568 = vst [vmem:[#allocation2 + $0x8] sm:$0xff] %v1540_v9 }
 0x2f5   :  { %v2244_v10 = vpop.f32.mrb[12].mxu0 }
 0x2f6   :  { %v1561_v11 = vadd.f32 %v2244_v10, %v1954_v59  ;;  %v1552_v12 = vpop.f32.mrb[13].mxu0 }
 0x2f7   :  { %v1553_v13 = vadd.f32 %v1954_v59, %v1552_v12  ;;  %v2245_v14 = vpop.f32.mrb[14].mxu0 }
 0x2f8   :  { %1573 = vst [vmem:[#allocation2 + $0x30] sm:$0xff] %v1561_v11  ;;  %v1564_v15 = vadd.f32 %v2245_v14, %v1954_v59  ;;  %v1555_v16 = vpop.f32.mrb[15].mxu0 }
 0x2f9   :  { %1571 = vst [vmem:[#allocation2 + $0x20] sm:$0xff] %v1553_v13  ;;  %v1556_v17 = vadd.f32 %v1954_v59, %v1555_v16 }
 0x2fa   :  { %1574 = vst [vmem:[#allocation2 + $0x38] sm:$0xff] %v1564_v15 }
 0x2fb   :  { %1572 = vst [vmem:[#allocation2 + $0x28] sm:$0xff] %v1556_v17 }
 0x2fc LB: > { %v2269_v20 = vpack.c.bf16 %v3078_v1, %v3076_v0  ;;  %v2842_v21 = vmov 0.0|0.0   ;;  %v2272_v5 = vpack.c.bf16 %v3082_v3, %v3080_v2  ;;  %vm2843_vm1 = vmmov 0   ;;  %s1961_s4 = sshll.u32 %s2825_s10, 3  ;;  %s2845_s21 = smov 64   ;;  %s2825_s10 = sphi %s3232_s10, %s1586_s10   ;;  %v2821_v19 = vphi %v2819_v19, %v2820_v19   ;;  %v2817_v18 = vphi %v2815_v18, %v2816_v18  }
 0x2fd   : > { %2268 = vmatprep.subr.bf16.mxu0 %v2842_v21  ;;  %v2844_v4 = vmov 0.0   ;;  %s1590_s20 = scalar_lea.vmem [#allocation2], %s1961_s4  ;;  %s2846_s5 = smov 32  }
 0x2fe   : > { %2270 = vmatpush3.bf16.msra.mxu0 %v2269_v20  ;;  %2254 = vmatprep.mubr.msk.f32.mxu0 %vm2843_vm1, %v2844_v4  ;;  %s2847_s19 = smov 96   ;;  %s1586_s10 = sadd.s32 1, %s2825_s10  }
 0x2ff   : > { %2271 = vmatprep.subr.bf16.mxu0 %v2842_v21  ;;  %p1583_p4 = scmp.ge.s32.totalorder %s1586_s10, 8  }
 0x300   :  { %v1704_v42 = vld [vmem:[#allocation15] sm:$0xff] (%p1583_p4)  ;;  %v1705_v43 = vld [vmem:[#allocation15 + $0x8] sm:$0xff] (%p1583_p4)  ;;  %v1706_v44 = vld [vmem:[#allocation15 + $0x10] sm:$0xff] (%p1583_p4)  ;;  %v2848_v45 = vmov (%p1583_p4), 0.0|0.0   ;;  %vm2849_vm2 = vmmov (%p1583_p4), 0   ;;  %v2850_v48 = vmov (%p1583_p4), 0.0  }
 0x301   :  { %v2275_v46 = vpack.c.bf16 (%p1583_p4), %v1705_v43, %v1704_v42  ;;  %v1707_v47 = vld [vmem:[#allocation15 + $0x18] sm:$0xff] (%p1583_p4)  ;;  %v1964_v0 = vld [vmem:[#allocation17] ss:$0 sm:$0xff] (%p1583_p4)  ;;  %vm1788_vm3 = vcmask (%p1583_p4), 15360   ;;  %s2851_s15 = smov (%p1583_p4), [#allocation22]  }
 0x302   : > { %2273 = vmatpush3.bf16.msra.mxu0 %v2272_v5  ;;  %v1591_v22 = vld [vmem:[%s1590_s20] sm:$0xff]  ;;  %v2278_v49 = vpack.c.bf16 (%p1583_p4), %v1707_v47, %v1706_v44  ;;  %s1819_s16 = sshll.u32 (%p1583_p4), %s2851_s15, 4  ;;  %s1820_s16 = int_to_ptr.vmem [resolvable:$true] %s1819_s16 }
 0x303   :  { %2274 = vmatprep.subr.bf16.mxu0 (%p1583_p4), %v2848_v45  ;;  %s2721_s1 = scalar_lea.vmem (%p1583_p4), %s1820_s16, 128  ;;  %p2726_p6 = scmp.lt.s32.totalorder (%p1583_p4), %s1820_s16, %s1820_s16 }
 0x304   :  { %p2722_p5 = scmp.ne.s32.totalorder (%p1583_p4), %s1820_s16, %s2721_s1  ;;  %p2727_p7 = scmp.lt.s32.totalorder (%p1583_p4), %s2721_s1, %s2721_s1 }
 0x305   : > { %2255 = vmatmul.mubr.msk.f32.vlgmr.msra.gmra.mrb[0].mxu0 %vm265_vm0, %v2821_v19 }
 0x306   :  { %2265 = vmatprep.mubr.msk.f32.mxu0 (%p1583_p4), %vm2849_vm2, %v2850_v48  ;;  %2276 = vmatpush3.bf16.msra.mxu0 (%p1583_p4), %v2275_v46  ;;  %p2728_p8 = por (%p1583_p4), %p2727_p7, %p2726_p6 }
 0x307   :  { %2277 = vmatprep.subr.bf16.mxu0 (%p1583_p4), %v2848_v45 }
 0x308   :  { %p2729_p9 = pnand (%p1583_p4), %p2728_p8, %p2722_p5 }
 0x30a   :  { %2279 = vmatpush3.bf16.msra.mxu0 (%p1583_p4), %v2278_v49 }
 0x3d8   : > { %v1661_v23 = vpop.f32.mrb[0].mxu0 }
 0x3d9   : > { %v1665_v24 = vadd.f32 %v1661_v23, %v1591_v22  ;;  %v2256_v25 = vpop.f32.mrb[1].mxu0 }
 0x3db   : > { %2467 = vtanh.f32 %v1665_v24  ;;  %v1963_v27 = vmul.f32 -1.442695, %v1665_v24 }
 0x3dd   : > { %2469 = vpow2.f32 %v1963_v27 }
 0x3e5   : > { %v2468_v26 = vpop.eup %2467 }
 0x3e6   : > { %1679 = vrot.lane.b32.xlu0 %v2468_v26, %s2845_s21 }
 0x3e7   : > { %v2470_v28 = vpop.eup %2469 }
 0x3e8   : > { %v1669_v29 = vadd.f32 1.0, %v2470_v28 }
 0x3ea   : > { %1674 = vrot.lane.b32.xlu0 %v2817_v18, %s2846_s5  ;;  %2471 = vrcp.f32 %v1669_v29 }
 0x3f4   : > { %v2472_v30 = vpop.eup %2471 }
 0x458   : > { %v1680_v31 = vpop.permute.xlu0 %1679 }
 0x459   : > { %v1682_v32 = vmul.f32 %v2472_v30, %v1680_v31 }
 0x45b   : > { %1684 = vrot.lane.b32.xlu1 %v1682_v32, %s2846_s5 }
 0x45c   : > { %v1675_v33 = vpop.permute.xlu0 %1674 }
 0x45d   : > { %v1677_v34 = vmul.f32 %v2472_v30, %v1675_v33 }
 0x4cd   : > { %v1685_v35 = vpop.permute.xlu1 %1684 }
 0x4ce   : > { %v1687_v36 = vadd.f32 %v1685_v35, %v1677_v34 }
 0x4d0   : > { %2473 = vtanh.f32 %v1687_v36 }
 0x4da   : > { %v2474_v37 = vpop.eup %2473 }
 0x4db   : > { %1690 = vrot.lane.b32.xlu1 %v2474_v37, %s2845_s21 }
 0x4df   : > { %1699 = vrot.lane.b32.xlu1 %v1687_v36, %s2847_s19 }
 0x54d   : > { %v1691_v38 = vpop.permute.xlu1 %1690 }
 0x54e   : > { %v1693_v39 = vmul.f32 %v2472_v30, %v1691_v38 }
 0x550   : > { %1695 = vrot.lane.b32.xlu0 %v1693_v39, %s2846_s5 }
 0x551   : > { %v1700_v40 = vpop.permute.xlu1 %1699  }
 0x552   : > { %v2816_v18 = vmov %v1700_v40   ;;  %1703 = vst.msk [vmem:[#allocation24] sm:$0xff] (%p1583_p4), %vm265_vm0, %v1700_v40 }
 0x5bd   :  { %1585 = sbr.rel (!%p1583_p4) target bundleno = 764 (0x2fc), region = 132 }
 0x5c2   : > { %v1696_v41 = vpop.permute.xlu0 %1695  }
 0x5c3   : > { %v2820_v19 = vmov %v1696_v41   ;;  %1702 = vst.msk [vmem:[#allocation22] sm:$0xff] (%p1583_p4), %vm265_vm0, %v1696_v41  ;;  %2266 = vmatmul.mubr.msk.f32.vlgmr.msra.gmra.mrb[0].mxu0 (%p1583_p4), %vm265_vm0, %v1696_v41 }
 0x696   :  { %v1784_v1 = vpop.f32.mrb[0].mxu0 }
 0x697   :  { %v1785_v2 = vadd.f32 %v1964_v0, %v1784_v1  ;;  %v2267_v3 = vpop.f32.mrb[1].mxu0 }
 0x699   :  { %v1789_v50 = vsel %vm1788_vm3, %v1785_v2, -inf }
 0x69a   :  { %1790 = vmax.xlane.f32.xlu0 %v1789_v50 }
 0x727   :  { %v1791_v51 = vpop.xlane.xlu0 %1790 }
 0x728   :  { %v1792_v52 = vsub.f32 %v1785_v2, %v1791_v51 }
 0x72a   :  { %v1793_v53 = vmul.f32 1.442695, %v1792_v52 }
 0x72c   :  { %2475 = vpow2.f32 %v1793_v53 }
 0x736   :  { %v2476_v54 = vpop.eup %2475 }
 0x737   :  { %v1795_v55 = vsel %vm1788_vm3, %v2476_v54, 0.0 }
 0x738   :  { %1796 = vadd.xlane.f32.xlu0 %v1795_v55 }
 0x739   :  { %2732 = shalt.err (!%p2729_p9)
}
 0x73a   :  { %s2733_s17 = scalar_lea.hbm %s3300_s12, 128 }
 0x73b   :  { %p2734_p10 = scmp.ne.s32.totalorder %s3300_s12, %s2733_s17  ;;  %p2737_p11 = scmp.lt.u32.totalorder %s2733_s17, %s3300_s12 }
 0x73d   :  { %p2739_p12 = pnand %p2737_p11, %p2734_p10 }
 0x73f   :  { %2742 = shalt.err (!%p2739_p12)
}
 0x740   :  { %1822 = dma.vmem_to_hbm [thread:$0]  %s1820_s16, 128, %s3300_s12, [#allocation23]  }
 0x741   :  { %s2852_s24 = smov [#allocation24]  }
 0x742   :  { %s1829_s25 = sshll.u32 %s2852_s24, 4  ;;  %s1830_s25 = int_to_ptr.vmem [resolvable:$true] %s1829_s25 }
 0x743   :  { %s2743_s7 = scalar_lea.vmem %s1830_s25, 128  ;;  %p2748_p0 = scmp.lt.s32.totalorder %s1830_s25, %s1830_s25 }
 0x744   :  { %p2744_p13 = scmp.ne.s32.totalorder %s1830_s25, %s2743_s7  ;;  %p2749_p1 = scmp.lt.s32.totalorder %s2743_s7, %s2743_s7 }
 0x746   :  { %p2750_p2 = por %p2749_p1, %p2748_p0 }
 0x748   :  { %p2751_p3 = pnand %p2750_p2, %p2744_p13 }
 0x74a   :  { %2754 = shalt.err (!%p2751_p3)
}
 0x74b   :  { %s2755_s27 = scalar_lea.hbm %s3301_s13, 128 }
 0x74c   :  { %p2756_p4 = scmp.ne.s32.totalorder %s3301_s13, %s2755_s27  ;;  %p2759_p5 = scmp.lt.u32.totalorder %s2755_s27, %s3301_s13 }
 0x74e   :  { %p2761_p6 = pnand %p2759_p5, %p2756_p4 }
 0x750   :  { %2764 = shalt.err (!%p2761_p6)
}
 0x751   :  { %1832 = dma.vmem_to_hbm [thread:$0]  %s1830_s25, 128, %s3301_s13, [#allocation23]  }
 0x752   :  { %s2853_s4 = smov [#allocation21]  }
 0x753   :  { %s1809_s20 = sshll.u32 %s2853_s4, 4  ;;  %s1810_s20 = int_to_ptr.vmem [resolvable:$true] %s1809_s20 }
 0x754   :  { %s2765_s21 = scalar_lea.vmem %s1810_s20, 128  ;;  %p2770_p8 = scmp.lt.s32.totalorder %s1810_s20, %s1810_s20 }
 0x755   :  { %p2766_p7 = scmp.ne.s32.totalorder %s1810_s20, %s2765_s21  ;;  %p2771_p9 = scmp.lt.s32.totalorder %s2765_s21, %s2765_s21 }
 0x757   :  { %p2772_p10 = por %p2771_p9, %p2770_p8 }
 0x759   :  { %p2773_p11 = pnand %p2772_p10, %p2766_p7 }
 0x7c5   :  { %v1797_v56 = vpop.xlane.xlu0 %1796 }
 0x7c6   :  { %2477 = vlog2.f32 %v1797_v56 }
 0x7d0   :  { %v2478_v57 = vpop.eup %2477 }
 0x7d1   :  { %v1799_v58 = vmul.f32 0.6931472, %v2478_v57 }
 0x7d3   :  { %v1800_v59 = vadd.f32 %v1799_v58, %v1791_v51 }
 0x7d5   :  { %v1801_v60 = vsub.f32 %v1785_v2, %v1800_v59 }
 0x7d7   :  { %1802 = vst.msk [vmem:[#allocation21] sm:$0xff] %vm1788_vm3, %v1801_v60 }
 0x7d8   :  { %2776 = shalt.err (!%p2773_p11)
}
 0x7d9   :  { %s2777_s19 = scalar_lea.hbm %s3299_s11, 128 }
 0x7da   :  { %p2778_p12 = scmp.ne.s32.totalorder %s3299_s11, %s2777_s19  ;;  %p2781_p13 = scmp.lt.u32.totalorder %s2777_s19, %s3299_s11 }
 0x7dc   :  { %p2783_p0 = pnand %p2781_p13, %p2778_p12 }
 0x7de   :  { %2786 = shalt.err (!%p2783_p0)
}
 0x7df   :  { %1812 = dma.vmem_to_hbm [thread:$0]  %s1810_s20, 128, %s3299_s11, [#allocation5]  }
 0x7e0   :  { %2811 = dma.done.wait [#allocation5], 128  }
 0x7e1   :  { %2812 = vsyncadd [#allocation5], 4294967168 }
 0x7e2   :  { %2813 = dma.done.wait [#allocation23], 256  }
 0x7e3   :  { %2814 = vsyncadd [#allocation23], 4294967040 }
 0x7e4   :  { %1842 = vsyncpa [#allocation4], 1 }
 0x7e5   :  { %1843 = vsyncpa [#allocation7], 1 }
 0x7e6   :  { %1844 = vsyncpa [#allocation10], 1 }
 0x7e7   :  { %1845 = vsyncpa [#allocation13], 1 }
 0x7e8   :  { %1846 = vsyncpa [#allocation16], 1 }
 0x7e9   :  { %1847 = vsyncpa [#allocation19], 1 }
 0x7ea   :  { %1848 = vsyncpa [#allocation5], 1 }
 0x7eb   :  { %1849 = vsyncpa [#allocation23], 1 }

</bundles_post_ra>
